<compile_context>
chip_gen: v7x
topology: tpu7x:2x2x1
jax: 0.10.0
libtpu: 0.0.40
codegen_flags: <defaults>
</compile_context>

<pallas_src>
import functools
import math

import jax
import jax.numpy as jnp
from jax.experimental import pallas as pl
from jax.experimental.pallas import tpu as pltpu


# ---------------------------------------------------------------------------
# helpers mirroring the PyTorch module
# ---------------------------------------------------------------------------
def get_sizes_list(dim, chunks):
    split_size = (dim + chunks - 1) // chunks
    sizes_list = [split_size] * chunks
    sizes_list[-1] = sizes_list[-1] - (sum(sizes_list) - dim)
    assert sum(sizes_list) == dim
    return sizes_list


# ---------------------------------------------------------------------------
# one-time parameter preparation (hoisted out of the per-call path)
# ---------------------------------------------------------------------------
def prepare_block_params(params, *, in0, in1, mm_dim, chunks, rank, output_dim,
                         weight_dtype=jnp.bfloat16):
    sizes = get_sizes_list(mm_dim, chunks)
    assert len(set(sizes)) == 1, "kernel assumes equal chunk sizes (mm_dim % chunks == 0)"
    size = sizes[0]
    sr = size * rank
    hi = jax.lax.Precision.HIGHEST

    # per-chunk column slices of linear0 / linear1
    w0l = params["w_lin0"].reshape(in0, chunks, size).transpose(1, 0, 2)   # (chunks, in0, size)
    b0l = params["b_lin0"].reshape(chunks, 1, size)
    w1l = params["w_lin1"].reshape(in1, chunks, size).transpose(1, 0, 2)   # (chunks, in1, size)
    b1l = params["b_lin1"].reshape(chunks, 1, size)
    wm0 = params["w_m0"]                                                   # (chunks, size, sr)
    bm0 = params["b_m0"].reshape(chunks, 1, sr)
    wm1 = params["w_m1"]
    bm1 = params["b_m1"].reshape(chunks, 1, sr)

    # algebraic fusion of linear{0,1} into the merge linears (exact; dropout_input == 0)
    wf0 = jnp.einsum("cis,csr->cir", w0l, wm0, precision=hi)               # (chunks, in0, sr)
    bf0 = jnp.einsum("cis,csr->cir", b0l, wm0, precision=hi) + bm0         # (chunks, 1, sr)
    wf1 = jnp.einsum("cis,csr->cir", w1l, wm1, precision=hi)
    bf1 = jnp.einsum("cis,csr->cir", b1l, wm1, precision=hi) + bm1

    wout = params["w_out"].reshape(chunks, size, output_dim)               # (chunks, size, out)
    bout = params["b_out"].reshape(1, output_dim)

    return {
        "wf0": wf0.astype(weight_dtype), "bf0": bf0.astype(jnp.float32),
        "wf1": wf1.astype(weight_dtype), "bf1": bf1.astype(jnp.float32),
        "wout": wout.astype(weight_dtype), "bout": bout.astype(jnp.float32),
        "size": size, "sr": sr,
    }


# ---------------------------------------------------------------------------
# Pallas kernel: grid = (num_splits, steps); one step processes `chunks_per_step` chunks
# ---------------------------------------------------------------------------
def block_fusion_kernel(
    x0_ref, x1_ref,            # (Bp, in0), (Bp, in1)              grid-constant
    wf0_ref, bf0_ref,          # (cp, in0, sr), (cp, 1, sr)        fused side-0 weights
    wf1_ref, bf1_ref,          # (cp, in1, sr), (cp, 1, sr)        fused side-1 weights
    wout_ref, bout_ref,        # (cp, size, out), (1, out)         row-slice of linear_out
    out_ref,                   # (1, Bp, out)  f32, resident accumulator per split
    *, rank, size, chunks_per_step,
):
    s = pl.program_id(0)   # split (parallel)
    g = pl.program_id(1)   # step within split (reduction into out_ref)

    @pl.when(g == 0)
    def _():
        bias = jnp.broadcast_to(bout_ref[...][None], out_ref.shape).astype(jnp.float32)
        # fold the output bias into split 0 only (splits are summed in the wrapper)
        out_ref[...] = jnp.where(s == 0, bias, jnp.zeros_like(bias))

    wdtype = wf0_ref.dtype
    x0 = x0_ref[...].astype(wdtype)
    x1 = x1_ref[...].astype(wdtype)

    acc = jnp.zeros(out_ref.shape, jnp.float32)
    for c in range(chunks_per_step):                 # static unroll over local chunks
        # fused (linear0 -> merge_linear0) / (linear1 -> merge_linear1)
        m0 = jnp.dot(x0, wf0_ref[c], preferred_element_type=jnp.float32) + bf0_ref[c]
        m1 = jnp.dot(x1, wf1_ref[c], preferred_element_type=jnp.float32) + bf1_ref[c]
        m = m0 * m1                                  # (Bp, size*rank)

        # rank-sum via lane-aligned static 128-wide slices
        z = m[:, 0:size]
        for r in range(1, rank):
            z = z + m[:, r * size:(r + 1) * size]    # (Bp, size)

        # signed sqrt (one EUP sqrt) + per-chunk L2 normalization ('before_cat')
        zs = jnp.sqrt(jnp.abs(z))
        z = jnp.where(z < 0, -zs, zs)
        ss = jnp.sum(z * z, axis=-1, keepdims=True)
        z = z * jax.lax.rsqrt(jnp.maximum(ss, 1e-24))

        # this chunk's contribution to linear_out
        acc = acc + jnp.dot(z.astype(wdtype), wout_ref[c],
                            preferred_element_type=jnp.float32)[None]

    out_ref[...] += acc


# ---------------------------------------------------------------------------
# wrapper
# ---------------------------------------------------------------------------
def block_forward(x0_in, x1_in, prep, *, chunks, rank, output_dim,
                  chunks_per_step=None, num_splits=1):
    B, in0 = x0_in.shape
    _, in1 = x1_in.shape
    size, sr = prep["size"], prep["sr"]

    if chunks_per_step is None:
        chunks_per_step = chunks // num_splits
    assert chunks % (num_splits * chunks_per_step) == 0
    steps = chunks // (num_splits * chunks_per_step)

    # pad batch to a full sublane multiple so activation vregs / output stores are unmasked
    B_pad = ((B + 7) // 8) * 8
    if B_pad != B:
        x0p = jnp.pad(x0_in, ((0, B_pad - B), (0, 0)))
        x1p = jnp.pad(x1_in, ((0, B_pad - B), (0, 0)))
    else:
        x0p, x1p = x0_in, x1_in

    kernel = functools.partial(block_fusion_kernel, rank=rank, size=size,
                               chunks_per_step=chunks_per_step)

    const2 = lambda s, g: (0, 0)
    wmap = lambda s, g: (s * steps + g, 0, 0)

    # explicit VMEM budget: double-buffered weight slabs per step + generous margin,
    # capped at v7x physical VMEM (64 MiB); never below the common 32 MiB default.
    itemsize = jnp.dtype(prep["wf0"].dtype).itemsize
    step_weight_bytes = chunks_per_step * ((in0 + in1) * sr + size * output_dim) * itemsize
    vmem_limit = min(64 << 20, max(32 << 20, 2 * step_weight_bytes + (8 << 20)))

    partial_out = pl.pallas_call(
        kernel,
        out_shape=jax.ShapeDtypeStruct((num_splits, B_pad, output_dim), jnp.float32),
        grid=(num_splits, steps),
        in_specs=[
            pl.BlockSpec((B_pad, in0), const2),
            pl.BlockSpec((B_pad, in1), const2),
            pl.BlockSpec((chunks_per_step, in0, sr), wmap),
            pl.BlockSpec((chunks_per_step, 1, sr), wmap),
            pl.BlockSpec((chunks_per_step, in1, sr), wmap),
            pl.BlockSpec((chunks_per_step, 1, sr), wmap),
            pl.BlockSpec((chunks_per_step, size, output_dim), wmap),
            pl.BlockSpec((1, output_dim), const2),
        ],
        out_specs=pl.BlockSpec((1, B_pad, output_dim), lambda s, g: (s, 0, 0)),
        compiler_params=pltpu.CompilerParams(
            dimension_semantics=("parallel", "arbitrary"),   # splits parallel; chunk steps reduce
            vmem_limit_bytes=vmem_limit,
        ),
    )(x0p, x1p, prep["wf0"], prep["bf0"], prep["wf1"], prep["bf1"],
      prep["wout"], prep["bout"])

    out = partial_out[0] if num_splits == 1 else jnp.sum(partial_out, axis=0)
    return out[:B]


# ---------------------------------------------------------------------------
# pure-JAX reference mirroring the PyTorch forward
# ---------------------------------------------------------------------------
def reference_jax(x0_in, x1_in, params, *, mm_dim, chunks, rank, pos_norm="before_cat"):
    sizes = get_sizes_list(mm_dim, chunks)
    x0 = x0_in @ params["w_lin0"] + params["b_lin0"]
    x1 = x1_in @ params["w_lin1"] + params["b_lin1"]
    B = x0.shape[0]
    zs, begin = [], 0
    for c, s in enumerate(sizes):
        x0c = x0[:, begin:begin + s]
        x1c = x1[:, begin:begin + s]
        m0 = x0c @ params["w_m0"][c] + params["b_m0"][c]
        m1 = x1c @ params["w_m1"][c] + params["b_m1"][c]
        m = (m0 * m1).reshape(B, rank, s)
        z = jnp.sum(m, axis=1)
        if pos_norm == "before_cat":
            z = jnp.sqrt(jax.nn.relu(z)) - jnp.sqrt(jax.nn.relu(-z))
            z = z / jnp.maximum(jnp.linalg.norm(z, axis=1, keepdims=True), 1e-12)
        zs.append(z)
        begin += s
    z = jnp.concatenate(zs, axis=1)
    if pos_norm == "after_cat":
        z = jnp.sqrt(jax.nn.relu(z)) - jnp.sqrt(jax.nn.relu(-z))
        z = z / jnp.maximum(jnp.linalg.norm(z, axis=1, keepdims=True), 1e-12)
    return z @ params["w_out"] + params["b_out"]


# ---------------------------------------------------------------------------
# deterministic synthetic parameters (torch nn.Linear-style uniform init)
# ---------------------------------------------------------------------------
def make_params(key, in0, in1, mm_dim, chunks, rank, output_dim):
    size = mm_dim // chunks
    ks = jax.random.split(key, 10)
    u = lambda k, shape, s: jax.random.uniform(k, shape, jnp.float32, -s, s)
    s0, s1 = 1.0 / math.sqrt(in0), 1.0 / math.sqrt(in1)
    sm, so = 1.0 / math.sqrt(size), 1.0 / math.sqrt(mm_dim)
    return {
        "w_lin0": u(ks[0], (in0, mm_dim), s0),
        "b_lin0": u(ks[1], (mm_dim,), s0),
        "w_lin1": u(ks[2], (in1, mm_dim), s1),
        "b_lin1": u(ks[3], (mm_dim,), s1),
        "w_m0": u(ks[4], (chunks, size, size * rank), sm),
        "b_m0": u(ks[5], (chunks, size * rank), sm),
        "w_m1": u(ks[6], (chunks, size, size * rank), sm),
        "b_m1": u(ks[7], (chunks, size * rank), sm),
        "w_out": u(ks[8], (mm_dim, output_dim), so),
        "b_out": u(ks[9], (output_dim,), so),
    }


if __name__ == "__main__":
    # small, TPU-friendly hyperparameters consistent with Block's forward:
    # chunk size = mm_dim // chunks = 128 (lane-dense), output_dim = 128.
    B = 2
    input_dims = (64, 32)
    mm_dim, chunks, rank, output_dim = 512, 4, 4, 128

    key = jax.random.PRNGKey(0)
    k0, k1, kp = jax.random.split(key, 3)
    x0 = jax.random.normal(k0, (B, input_dims[0]), jnp.float32)
    x1 = jax.random.normal(k1, (B, input_dims[1]), jnp.float32)
    params = make_params(kp, input_dims[0], input_dims[1], mm_dim, chunks, rank, output_dim)

    ref = reference_jax(x0, x1, params, mm_dim=mm_dim, chunks=chunks, rank=rank)

    # 1) f32-weight path: validates the fused algebra tightly.
    prep32 = prepare_block_params(params, in0=input_dims[0], in1=input_dims[1],
                                  mm_dim=mm_dim, chunks=chunks, rank=rank,
                                  output_dim=output_dim, weight_dtype=jnp.float32)
    out32 = jax.block_until_ready(
        block_forward(x0, x1, prep32, chunks=chunks, rank=rank, output_dim=output_dim))
    assert out32.shape == (B, output_dim)
    assert jnp.allclose(out32, ref, atol=2e-3, rtol=2e-3), "f32-weight path mismatch"

    # 2) bf16 weight-streaming fast path (single grid step, everything resident).
    prep16 = prepare_block_params(params, in0=input_dims[0], in1=input_dims[1],
                                  mm_dim=mm_dim, chunks=chunks, rank=rank,
                                  output_dim=output_dim, weight_dtype=jnp.bfloat16)
    out16 = jax.block_until_ready(
        block_forward(x0, x1, prep16, chunks=chunks, rank=rank, output_dim=output_dim))
    assert out16.shape == (B, output_dim)
    assert jnp.allclose(out16, ref, atol=1e-2, rtol=5e-2), "bf16 path mismatch"

    # 3) dual-TensorCore split of the chunk axis (the v7x configuration; also correct on 1-TC chips).
    out16_split = jax.block_until_ready(
        block_forward(x0, x1, prep16, chunks=chunks, rank=rank, output_dim=output_dim,
                      num_splits=2, chunks_per_step=2))
    assert out16_split.shape == (B, output_dim)
    assert jnp.allclose(out16_split, ref, atol=1e-2, rtol=5e-2), "split path mismatch"

    print("KERNEL_OK")
</pallas_src>

<mosaic_0001>
module attributes {stable_mosaic.version = 11 : i64} {
  func.func @block_fusion_kernel(%arg0: i32, %arg1: i32, %arg2: memref<8x64xf32, #tpu.memory_space<vmem>>, %arg3: memref<8x32xf32, #tpu.memory_space<vmem>>, %arg4: memref<4x64x512xf32, #tpu.memory_space<vmem>>, %arg5: memref<4x1x512xf32, #tpu.memory_space<vmem>>, %arg6: memref<4x32x512xf32, #tpu.memory_space<vmem>>, %arg7: memref<4x1x512xf32, #tpu.memory_space<vmem>>, %arg8: memref<4x128x128xf32, #tpu.memory_space<vmem>>, %arg9: memref<1x128xf32, #tpu.memory_space<vmem>>, %arg10: memref<1x8x128xf32, #tpu.memory_space<vmem>>) attributes {dimension_semantics = [#tpu.dimension_semantics<parallel>, #tpu.dimension_semantics<arbitrary>], iteration_bounds = array<i64: 1, 1>, scalar_prefetch = 0 : i64, scratch_operands = 0 : i64, tpu.core_type = #tpu.core_type<tc>, window_params = [{pipeline_mode = #tpu.pipeline_mode<synchronous>, transform_indices = @transform_0, window_bounds = array<i64: 8, 64>}, {pipeline_mode = #tpu.pipeline_mode<synchronous>, transform_indices = @transform_1, window_bounds = array<i64: 8, 32>}, {transform_indices = @transform_2, window_bounds = array<i64: 4, 64, 512>}, {transform_indices = @transform_3, window_bounds = array<i64: 4, 1, 512>}, {transform_indices = @transform_4, window_bounds = array<i64: 4, 32, 512>}, {transform_indices = @transform_5, window_bounds = array<i64: 4, 1, 512>}, {transform_indices = @transform_6, window_bounds = array<i64: 4, 128, 128>}, {pipeline_mode = #tpu.pipeline_mode<synchronous>, transform_indices = @transform_7, window_bounds = array<i64: 1, 128>}, {transform_indices = @transform_8, window_bounds = array<i64: 1, 8, 128>}]} {
    %c0_i32 = arith.constant 0 : i32
    %0 = arith.cmpi eq, %arg1, %c0_i32 : i32
    %1 = arith.extui %0 : i1 to i32
    %c0_i32_0 = arith.constant 0 : i32
    %2 = arith.cmpi ne, %1, %c0_i32_0 : i32
    scf.if %2 {
      %c0_95 = arith.constant 0 : index
      %c0_96 = arith.constant 0 : index
      %177 = vector.load %arg9[%c0_95, %c0_96] : memref<1x128xf32, #tpu.memory_space<vmem>>, vector<1x128xf32>
      %178 = vector.shape_cast %177 : vector<1x128xf32> to vector<1x1x128xf32>
      %179 = vector.shape_cast %178 : vector<1x1x128xf32> to vector<1x1x128xf32>
      %180 = vector.broadcast %179 : vector<1x1x128xf32> to vector<1x8x128xf32>
      %c0_i32_97 = arith.constant 0 : i32
      %181 = arith.cmpi eq, %arg0, %c0_i32_97 : i32
      %cst_98 = arith.constant 0.000000e+00 : f32
      %182 = vector.broadcast %cst_98 : f32 to vector<1x8x128xf32>
      %183 = arith.select %181, %180, %182 : vector<1x8x128xf32>
      %c0_99 = arith.constant 0 : index
      %c0_100 = arith.constant 0 : index
      %c0_101 = arith.constant 0 : index
      %184 = vector.load %arg10[%c0_99, %c0_100, %c0_101] : memref<1x8x128xf32, #tpu.memory_space<vmem>>, vector<1x8x128xf32>
      tpu.vector_store %arg10[%c0_99, %c0_100, %c0_101], %183 {strides = array<i32>} : memref<1x8x128xf32, #tpu.memory_space<vmem>>, vector<1x8x128xf32>,
    } else {
    }
    %c0 = arith.constant 0 : index
    %c0_1 = arith.constant 0 : index
    %3 = vector.load %arg2[%c0, %c0_1] : memref<8x64xf32, #tpu.memory_space<vmem>>, vector<8x64xf32>
    %c0_2 = arith.constant 0 : index
    %c0_3 = arith.constant 0 : index
    %4 = vector.load %arg3[%c0_2, %c0_3] : memref<8x32xf32, #tpu.memory_space<vmem>>, vector<8x32xf32>
    %cst = arith.constant 0.000000e+00 : f32
    %5 = vector.broadcast %cst : f32 to vector<1x8x128xf32>
    %c0_4 = arith.constant 0 : index
    %c0_5 = arith.constant 0 : index
    %c0_6 = arith.constant 0 : index
    %6 = vector.load %arg4[%c0_4, %c0_5, %c0_6] : memref<4x64x512xf32, #tpu.memory_space<vmem>>, vector<1x64x512xf32>
    %7 = vector.shape_cast %6 : vector<1x64x512xf32> to vector<64x512xf32>
    %cst_7 = arith.constant dense<0.000000e+00> : vector<8x512xf32>
    %8 = tpu.matmul %3, %7, %cst_7 {dimension_numbers = #tpu.dot_dimension_numbers<[1], [0], [0], [1], [0, 0, 1, 1], [], []>} : vector<8x64xf32>, vector<64x512xf32>, vector<8x512xf32> -> vector<8x512xf32>
    %c0_8 = arith.constant 0 : index
    %c0_9 = arith.constant 0 : index
    %c0_10 = arith.constant 0 : index
    %9 = vector.load %arg5[%c0_8, %c0_9, %c0_10] : memref<4x1x512xf32, #tpu.memory_space<vmem>>, vector<1x1x512xf32>
    %10 = vector.shape_cast %9 : vector<1x1x512xf32> to vector<1x512xf32>
    %11 = vector.broadcast %10 : vector<1x512xf32> to vector<8x512xf32>
    %12 = arith.addf %8, %11 : vector<8x512xf32>
    %c0_11 = arith.constant 0 : index
    %c0_12 = arith.constant 0 : index
    %c0_13 = arith.constant 0 : index
    %13 = vector.load %arg6[%c0_11, %c0_12, %c0_13] : memref<4x32x512xf32, #tpu.memory_space<vmem>>, vector<1x32x512xf32>
    %14 = vector.shape_cast %13 : vector<1x32x512xf32> to vector<32x512xf32>
    %cst_14 = arith.constant dense<0.000000e+00> : vector<8x512xf32>
    %15 = tpu.matmul %4, %14, %cst_14 {dimension_numbers = #tpu.dot_dimension_numbers<[1], [0], [0], [1], [0, 0, 1, 1], [], []>} : vector<8x32xf32>, vector<32x512xf32>, vector<8x512xf32> -> vector<8x512xf32>
    %c0_15 = arith.constant 0 : index
    %c0_16 = arith.constant 0 : index
    %c0_17 = arith.constant 0 : index
    %16 = vector.load %arg7[%c0_15, %c0_16, %c0_17] : memref<4x1x512xf32, #tpu.memory_space<vmem>>, vector<1x1x512xf32>
    %17 = vector.shape_cast %16 : vector<1x1x512xf32> to vector<1x512xf32>
    %18 = vector.broadcast %17 : vector<1x512xf32> to vector<8x512xf32>
    %19 = arith.addf %15, %18 : vector<8x512xf32>
    %20 = arith.mulf %12, %19 : vector<8x512xf32>
    %21 = vector.extract_strided_slice %20 {offsets = [0, 0], sizes = [8, 128], strides = [1, 1]} : vector<8x512xf32> to vector<8x128xf32>
    %22 = vector.extract_strided_slice %20 {offsets = [0, 128], sizes = [8, 128], strides = [1, 1]} : vector<8x512xf32> to vector<8x128xf32>
    %23 = arith.addf %21, %22 : vector<8x128xf32>
    %24 = vector.extract_strided_slice %20 {offsets = [0, 256], sizes = [8, 128], strides = [1, 1]} : vector<8x512xf32> to vector<8x128xf32>
    %25 = arith.addf %23, %24 : vector<8x128xf32>
    %26 = vector.extract_strided_slice %20 {offsets = [0, 384], sizes = [8, 128], strides = [1, 1]} : vector<8x512xf32> to vector<8x128xf32>
    %27 = arith.addf %25, %26 : vector<8x128xf32>
    %28 = math.absf %27 : vector<8x128xf32>
    %29 = math.sqrt %28 : vector<8x128xf32>
    %cst_18 = arith.constant 0.000000e+00 : f32
    %30 = vector.broadcast %cst_18 : f32 to vector<8x128xf32>
    %31 = arith.cmpf olt, %27, %30 : vector<8x128xf32>
    %cst_19 = arith.constant 0.000000e+00 : f32
    %32 = vector.broadcast %cst_19 : f32 to vector<8x128xf32>
    %33 = arith.subf %32, %29 : vector<8x128xf32>
    %34 = arith.select %31, %33, %29 : vector<8x128xi1>, vector<8x128xf32>
    %35 = arith.mulf %34, %34 : vector<8x128xf32>
    %cst_20 = arith.constant dense<0.000000e+00> : vector<8xf32>
    %36 = vector.multi_reduction <add>, %35, %cst_20 [1] : vector<8x128xf32> to vector<8xf32>
    %37 = vector.shape_cast %36 : vector<8xf32> to vector<8x1xf32>
    %cst_21 = arith.constant 1.000000e-24 : f32
    %38 = vector.broadcast %cst_21 : f32 to vector<8x1xf32>
    %39 = arith.maximumf %37, %38 : vector<8x1xf32>
    %40 = math.rsqrt %39 : vector<8x1xf32>
    %41 = vector.broadcast %40 : vector<8x1xf32> to vector<8x128xf32>
    %42 = arith.mulf %34, %41 : vector<8x128xf32>
    %c0_22 = arith.constant 0 : index
    %c0_23 = arith.constant 0 : index
    %c0_24 = arith.constant 0 : index
    %43 = vector.load %arg8[%c0_22, %c0_23, %c0_24] : memref<4x128x128xf32, #tpu.memory_space<vmem>>, vector<1x128x128xf32>
    %44 = vector.shape_cast %43 : vector<1x128x128xf32> to vector<128x128xf32>
    %cst_25 = arith.constant dense<0.000000e+00> : vector<8x128xf32>
    %45 = tpu.matmul %42, %44, %cst_25 {dimension_numbers = #tpu.dot_dimension_numbers<[1], [0], [0], [1], [0, 0, 1, 1], [], []>} : vector<8x128xf32>, vector<128x128xf32>, vector<8x128xf32> -> vector<8x128xf32>
    %46 = vector.shape_cast %45 : vector<8x128xf32> to vector<1x8x128xf32>
    %47 = arith.addf %5, %46 : vector<1x8x128xf32>
    %c1 = arith.constant 1 : index
    %c0_26 = arith.constant 0 : index
    %c0_27 = arith.constant 0 : index
    %48 = vector.load %arg4[%c1, %c0_26, %c0_27] : memref<4x64x512xf32, #tpu.memory_space<vmem>>, vector<1x64x512xf32>
    %49 = vector.shape_cast %48 : vector<1x64x512xf32> to vector<64x512xf32>
    %cst_28 = arith.constant dense<0.000000e+00> : vector<8x512xf32>
    %50 = tpu.matmul %3, %49, %cst_28 {dimension_numbers = #tpu.dot_dimension_numbers<[1], [0], [0], [1], [0, 0, 1, 1], [], []>} : vector<8x64xf32>, vector<64x512xf32>, vector<8x512xf32> -> vector<8x512xf32>
    %c1_29 = arith.constant 1 : index
    %c0_30 = arith.constant 0 : index
    %c0_31 = arith.constant 0 : index
    %51 = vector.load %arg5[%c1_29, %c0_30, %c0_31] : memref<4x1x512xf32, #tpu.memory_space<vmem>>, vector<1x1x512xf32>
    %52 = vector.shape_cast %51 : vector<1x1x512xf32> to vector<1x512xf32>
    %53 = vector.broadcast %52 : vector<1x512xf32> to vector<8x512xf32>
    %54 = arith.addf %50, %53 : vector<8x512xf32>
    %c1_32 = arith.constant 1 : index
    %c0_33 = arith.constant 0 : index
    %c0_34 = arith.constant 0 : index
    %55 = vector.load %arg6[%c1_32, %c0_33, %c0_34] : memref<4x32x512xf32, #tpu.memory_space<vmem>>, vector<1x32x512xf32>
    %56 = vector.shape_cast %55 : vector<1x32x512xf32> to vector<32x512xf32>
    %cst_35 = arith.constant dense<0.000000e+00> : vector<8x512xf32>
    %57 = tpu.matmul %4, %56, %cst_35 {dimension_numbers = #tpu.dot_dimension_numbers<[1], [0], [0], [1], [0, 0, 1, 1], [], []>} : vector<8x32xf32>, vector<32x512xf32>, vector<8x512xf32> -> vector<8x512xf32>
    %c1_36 = arith.constant 1 : index
    %c0_37 = arith.constant 0 : index
    %c0_38 = arith.constant 0 : index
    %58 = vector.load %arg7[%c1_36, %c0_37, %c0_38] : memref<4x1x512xf32, #tpu.memory_space<vmem>>, vector<1x1x512xf32>
    %59 = vector.shape_cast %58 : vector<1x1x512xf32> to vector<1x512xf32>
    %60 = vector.broadcast %59 : vector<1x512xf32> to vector<8x512xf32>
    %61 = arith.addf %57, %60 : vector<8x512xf32>
    %62 = arith.mulf %54, %61 : vector<8x512xf32>
    %63 = vector.extract_strided_slice %62 {offsets = [0, 0], sizes = [8, 128], strides = [1, 1]} : vector<8x512xf32> to vector<8x128xf32>
    %64 = vector.extract_strided_slice %62 {offsets = [0, 128], sizes = [8, 128], strides = [1, 1]} : vector<8x512xf32> to vector<8x128xf32>
    %65 = arith.addf %63, %64 : vector<8x128xf32>
    %66 = vector.extract_strided_slice %62 {offsets = [0, 256], sizes = [8, 128], strides = [1, 1]} : vector<8x512xf32> to vector<8x128xf32>
    %67 = arith.addf %65, %66 : vector<8x128xf32>
    %68 = vector.extract_strided_slice %62 {offsets = [0, 384], sizes = [8, 128], strides = [1, 1]} : vector<8x512xf32> to vector<8x128xf32>
    %69 = arith.addf %67, %68 : vector<8x128xf32>
    %70 = math.absf %69 : vector<8x128xf32>
    %71 = math.sqrt %70 : vector<8x128xf32>
    %cst_39 = arith.constant 0.000000e+00 : f32
    %72 = vector.broadcast %cst_39 : f32 to vector<8x128xf32>
    %73 = arith.cmpf olt, %69, %72 : vector<8x128xf32>
    %cst_40 = arith.constant 0.000000e+00 : f32
    %74 = vector.broadcast %cst_40 : f32 to vector<8x128xf32>
    %75 = arith.subf %74, %71 : vector<8x128xf32>
    %76 = arith.select %73, %75, %71 : vector<8x128xi1>, vector<8x128xf32>
    %77 = arith.mulf %76, %76 : vector<8x128xf32>
    %cst_41 = arith.constant dense<0.000000e+00> : vector<8xf32>
    %78 = vector.multi_reduction <add>, %77, %cst_41 [1] : vector<8x128xf32> to vector<8xf32>
    %79 = vector.shape_cast %78 : vector<8xf32> to vector<8x1xf32>
    %cst_42 = arith.constant 1.000000e-24 : f32
    %80 = vector.broadcast %cst_42 : f32 to vector<8x1xf32>
    %81 = arith.maximumf %79, %80 : vector<8x1xf32>
    %82 = math.rsqrt %81 : vector<8x1xf32>
    %83 = vector.broadcast %82 : vector<8x1xf32> to vector<8x128xf32>
    %84 = arith.mulf %76, %83 : vector<8x128xf32>
    %c1_43 = arith.constant 1 : index
    %c0_44 = arith.constant 0 : index
    %c0_45 = arith.constant 0 : index
    %85 = vector.load %arg8[%c1_43, %c0_44, %c0_45] : memref<4x128x128xf32, #tpu.memory_space<vmem>>, vector<1x128x128xf32>
    %86 = vector.shape_cast %85 : vector<1x128x128xf32> to vector<128x128xf32>
    %cst_46 = arith.constant dense<0.000000e+00> : vector<8x128xf32>
    %87 = tpu.matmul %84, %86, %cst_46 {dimension_numbers = #tpu.dot_dimension_numbers<[1], [0], [0], [1], [0, 0, 1, 1], [], []>} : vector<8x128xf32>, vector<128x128xf32>, vector<8x128xf32> -> vector<8x128xf32>
    %88 = vector.shape_cast %87 : vector<8x128xf32> to vector<1x8x128xf32>
    %89 = arith.addf %47, %88 : vector<1x8x128xf32>
    %c2 = arith.constant 2 : index
    %c0_47 = arith.constant 0 : index
    %c0_48 = arith.constant 0 : index
    %90 = vector.load %arg4[%c2, %c0_47, %c0_48] : memref<4x64x512xf32, #tpu.memory_space<vmem>>, vector<1x64x512xf32>
    %91 = vector.shape_cast %90 : vector<1x64x512xf32> to vector<64x512xf32>
    %cst_49 = arith.constant dense<0.000000e+00> : vector<8x512xf32>
    %92 = tpu.matmul %3, %91, %cst_49 {dimension_numbers = #tpu.dot_dimension_numbers<[1], [0], [0], [1], [0, 0, 1, 1], [], []>} : vector<8x64xf32>, vector<64x512xf32>, vector<8x512xf32> -> vector<8x512xf32>
    %c2_50 = arith.constant 2 : index
    %c0_51 = arith.constant 0 : index
    %c0_52 = arith.constant 0 : index
    %93 = vector.load %arg5[%c2_50, %c0_51, %c0_52] : memref<4x1x512xf32, #tpu.memory_space<vmem>>, vector<1x1x512xf32>
    %94 = vector.shape_cast %93 : vector<1x1x512xf32> to vector<1x512xf32>
    %95 = vector.broadcast %94 : vector<1x512xf32> to vector<8x512xf32>
    %96 = arith.addf %92, %95 : vector<8x512xf32>
    %c2_53 = arith.constant 2 : index
    %c0_54 = arith.constant 0 : index
    %c0_55 = arith.constant 0 : index
    %97 = vector.load %arg6[%c2_53, %c0_54, %c0_55] : memref<4x32x512xf32, #tpu.memory_space<vmem>>, vector<1x32x512xf32>
    %98 = vector.shape_cast %97 : vector<1x32x512xf32> to vector<32x512xf32>
    %cst_56 = arith.constant dense<0.000000e+00> : vector<8x512xf32>
    %99 = tpu.matmul %4, %98, %cst_56 {dimension_numbers = #tpu.dot_dimension_numbers<[1], [0], [0], [1], [0, 0, 1, 1], [], []>} : vector<8x32xf32>, vector<32x512xf32>, vector<8x512xf32> -> vector<8x512xf32>
    %c2_57 = arith.constant 2 : index
    %c0_58 = arith.constant 0 : index
    %c0_59 = arith.constant 0 : index
    %100 = vector.load %arg7[%c2_57, %c0_58, %c0_59] : memref<4x1x512xf32, #tpu.memory_space<vmem>>, vector<1x1x512xf32>
    %101 = vector.shape_cast %100 : vector<1x1x512xf32> to vector<1x512xf32>
    %102 = vector.broadcast %101 : vector<1x512xf32> to vector<8x512xf32>
    %103 = arith.addf %99, %102 : vector<8x512xf32>
    %104 = arith.mulf %96, %103 : vector<8x512xf32>
    %105 = vector.extract_strided_slice %104 {offsets = [0, 0], sizes = [8, 128], strides = [1, 1]} : vector<8x512xf32> to vector<8x128xf32>
    %106 = vector.extract_strided_slice %104 {offsets = [0, 128], sizes = [8, 128], strides = [1, 1]} : vector<8x512xf32> to vector<8x128xf32>
    %107 = arith.addf %105, %106 : vector<8x128xf32>
    %108 = vector.extract_strided_slice %104 {offsets = [0, 256], sizes = [8, 128], strides = [1, 1]} : vector<8x512xf32> to vector<8x128xf32>
    %109 = arith.addf %107, %108 : vector<8x128xf32>
    %110 = vector.extract_strided_slice %104 {offsets = [0, 384], sizes = [8, 128], strides = [1, 1]} : vector<8x512xf32> to vector<8x128xf32>
    %111 = arith.addf %109, %110 : vector<8x128xf32>
    %112 = math.absf %111 : vector<8x128xf32>
    %113 = math.sqrt %112 : vector<8x128xf32>
    %cst_60 = arith.constant 0.000000e+00 : f32
    %114 = vector.broadcast %cst_60 : f32 to vector<8x128xf32>
    %115 = arith.cmpf olt, %111, %114 : vector<8x128xf32>
    %cst_61 = arith.constant 0.000000e+00 : f32
    %116 = vector.broadcast %cst_61 : f32 to vector<8x128xf32>
    %117 = arith.subf %116, %113 : vector<8x128xf32>
    %118 = arith.select %115, %117, %113 : vector<8x128xi1>, vector<8x128xf32>
    %119 = arith.mulf %118, %118 : vector<8x128xf32>
    %cst_62 = arith.constant dense<0.000000e+00> : vector<8xf32>
    %120 = vector.multi_reduction <add>, %119, %cst_62 [1] : vector<8x128xf32> to vector<8xf32>
    %121 = vector.shape_cast %120 : vector<8xf32> to vector<8x1xf32>
    %cst_63 = arith.constant 1.000000e-24 : f32
    %122 = vector.broadcast %cst_63 : f32 to vector<8x1xf32>
    %123 = arith.maximumf %121, %122 : vector<8x1xf32>
    %124 = math.rsqrt %123 : vector<8x1xf32>
    %125 = vector.broadcast %124 : vector<8x1xf32> to vector<8x128xf32>
    %126 = arith.mulf %118, %125 : vector<8x128xf32>
    %c2_64 = arith.constant 2 : index
    %c0_65 = arith.constant 0 : index
    %c0_66 = arith.constant 0 : index
    %127 = vector.load %arg8[%c2_64, %c0_65, %c0_66] : memref<4x128x128xf32, #tpu.memory_space<vmem>>, vector<1x128x128xf32>
    %128 = vector.shape_cast %127 : vector<1x128x128xf32> to vector<128x128xf32>
    %cst_67 = arith.constant dense<0.000000e+00> : vector<8x128xf32>
    %129 = tpu.matmul %126, %128, %cst_67 {dimension_numbers = #tpu.dot_dimension_numbers<[1], [0], [0], [1], [0, 0, 1, 1], [], []>} : vector<8x128xf32>, vector<128x128xf32>, vector<8x128xf32> -> vector<8x128xf32>
    %130 = vector.shape_cast %129 : vector<8x128xf32> to vector<1x8x128xf32>
    %131 = arith.addf %89, %130 : vector<1x8x128xf32>
    %c3 = arith.constant 3 : index
    %c0_68 = arith.constant 0 : index
    %c0_69 = arith.constant 0 : index
    %132 = vector.load %arg4[%c3, %c0_68, %c0_69] : memref<4x64x512xf32, #tpu.memory_space<vmem>>, vector<1x64x512xf32>
    %133 = vector.shape_cast %132 : vector<1x64x512xf32> to vector<64x512xf32>
    %cst_70 = arith.constant dense<0.000000e+00> : vector<8x512xf32>
    %134 = tpu.matmul %3, %133, %cst_70 {dimension_numbers = #tpu.dot_dimension_numbers<[1], [0], [0], [1], [0, 0, 1, 1], [], []>} : vector<8x64xf32>, vector<64x512xf32>, vector<8x512xf32> -> vector<8x512xf32>
    %c3_71 = arith.constant 3 : index
    %c0_72 = arith.constant 0 : index
    %c0_73 = arith.constant 0 : index
    %135 = vector.load %arg5[%c3_71, %c0_72, %c0_73] : memref<4x1x512xf32, #tpu.memory_space<vmem>>, vector<1x1x512xf32>
    %136 = vector.shape_cast %135 : vector<1x1x512xf32> to vector<1x512xf32>
    %137 = vector.broadcast %136 : vector<1x512xf32> to vector<8x512xf32>
    %138 = arith.addf %134, %137 : vector<8x512xf32>
    %c3_74 = arith.constant 3 : index
    %c0_75 = arith.constant 0 : index
    %c0_76 = arith.constant 0 : index
    %139 = vector.load %arg6[%c3_74, %c0_75, %c0_76] : memref<4x32x512xf32, #tpu.memory_space<vmem>>, vector<1x32x512xf32>
    %140 = vector.shape_cast %139 : vector<1x32x512xf32> to vector<32x512xf32>
    %cst_77 = arith.constant dense<0.000000e+00> : vector<8x512xf32>
    %141 = tpu.matmul %4, %140, %cst_77 {dimension_numbers = #tpu.dot_dimension_numbers<[1], [0], [0], [1], [0, 0, 1, 1], [], []>} : vector<8x32xf32>, vector<32x512xf32>, vector<8x512xf32> -> vector<8x512xf32>
    %c3_78 = arith.constant 3 : index
    %c0_79 = arith.constant 0 : index
    %c0_80 = arith.constant 0 : index
    %142 = vector.load %arg7[%c3_78, %c0_79, %c0_80] : memref<4x1x512xf32, #tpu.memory_space<vmem>>, vector<1x1x512xf32>
    %143 = vector.shape_cast %142 : vector<1x1x512xf32> to vector<1x512xf32>
    %144 = vector.broadcast %143 : vector<1x512xf32> to vector<8x512xf32>
    %145 = arith.addf %141, %144 : vector<8x512xf32>
    %146 = arith.mulf %138, %145 : vector<8x512xf32>
    %147 = vector.extract_strided_slice %146 {offsets = [0, 0], sizes = [8, 128], strides = [1, 1]} : vector<8x512xf32> to vector<8x128xf32>
    %148 = vector.extract_strided_slice %146 {offsets = [0, 128], sizes = [8, 128], strides = [1, 1]} : vector<8x512xf32> to vector<8x128xf32>
    %149 = arith.addf %147, %148 : vector<8x128xf32>
    %150 = vector.extract_strided_slice %146 {offsets = [0, 256], sizes = [8, 128], strides = [1, 1]} : vector<8x512xf32> to vector<8x128xf32>
    %151 = arith.addf %149, %150 : vector<8x128xf32>
    %152 = vector.extract_strided_slice %146 {offsets = [0, 384], sizes = [8, 128], strides = [1, 1]} : vector<8x512xf32> to vector<8x128xf32>
    %153 = arith.addf %151, %152 : vector<8x128xf32>
    %154 = math.absf %153 : vector<8x128xf32>
    %155 = math.sqrt %154 : vector<8x128xf32>
    %cst_81 = arith.constant 0.000000e+00 : f32
    %156 = vector.broadcast %cst_81 : f32 to vector<8x128xf32>
    %157 = arith.cmpf olt, %153, %156 : vector<8x128xf32>
    %cst_82 = arith.constant 0.000000e+00 : f32
    %158 = vector.broadcast %cst_82 : f32 to vector<8x128xf32>
    %159 = arith.subf %158, %155 : vector<8x128xf32>
    %160 = arith.select %157, %159, %155 : vector<8x128xi1>, vector<8x128xf32>
    %161 = arith.mulf %160, %160 : vector<8x128xf32>
    %cst_83 = arith.constant dense<0.000000e+00> : vector<8xf32>
    %162 = vector.multi_reduction <add>, %161, %cst_83 [1] : vector<8x128xf32> to vector<8xf32>
    %163 = vector.shape_cast %162 : vector<8xf32> to vector<8x1xf32>
    %cst_84 = arith.constant 1.000000e-24 : f32
    %164 = vector.broadcast %cst_84 : f32 to vector<8x1xf32>
    %165 = arith.maximumf %163, %164 : vector<8x1xf32>
    %166 = math.rsqrt %165 : vector<8x1xf32>
    %167 = vector.broadcast %166 : vector<8x1xf32> to vector<8x128xf32>
    %168 = arith.mulf %160, %167 : vector<8x128xf32>
    %c3_85 = arith.constant 3 : index
    %c0_86 = arith.constant 0 : index
    %c0_87 = arith.constant 0 : index
    %169 = vector.load %arg8[%c3_85, %c0_86, %c0_87] : memref<4x128x128xf32, #tpu.memory_space<vmem>>, vector<1x128x128xf32>
    %170 = vector.shape_cast %169 : vector<1x128x128xf32> to vector<128x128xf32>
    %cst_88 = arith.constant dense<0.000000e+00> : vector<8x128xf32>
    %171 = tpu.matmul %168, %170, %cst_88 {dimension_numbers = #tpu.dot_dimension_numbers<[1], [0], [0], [1], [0, 0, 1, 1], [], []>} : vector<8x128xf32>, vector<128x128xf32>, vector<8x128xf32> -> vector<8x128xf32>
    %172 = vector.shape_cast %171 : vector<8x128xf32> to vector<1x8x128xf32>
    %173 = arith.addf %131, %172 : vector<1x8x128xf32>
    %c0_89 = arith.constant 0 : index
    %c0_90 = arith.constant 0 : index
    %c0_91 = arith.constant 0 : index
    %174 = vector.load %arg10[%c0_89, %c0_90, %c0_91] : memref<1x8x128xf32, #tpu.memory_space<vmem>>, vector<1x8x128xf32>
    %175 = arith.addf %174, %173 : vector<1x8x128xf32>
    %c0_92 = arith.constant 0 : index
    %c0_93 = arith.constant 0 : index
    %c0_94 = arith.constant 0 : index
    %176 = vector.load %arg10[%c0_92, %c0_93, %c0_94] : memref<1x8x128xf32, #tpu.memory_space<vmem>>, vector<1x8x128xf32>
    tpu.vector_store %arg10[%c0_92, %c0_93, %c0_94], %175 {strides = array<i32>} : memref<1x8x128xf32, #tpu.memory_space<vmem>>, vector<1x8x128xf32>,
    return
  }
  func.func @transform_0(%arg0: i32, %arg1: i32) -> (i32, i32) {
    %c0_i32 = arith.constant 0 : i32
    %c0_i32_0 = arith.constant 0 : i32
    %c0_i32_1 = arith.constant 0 : i32
    return %c0_i32, %c0_i32_0 : i32, i32
  }
  func.func @transform_1(%arg0: i32, %arg1: i32) -> (i32, i32) {
    %c0_i32 = arith.constant 0 : i32
    %c0_i32_0 = arith.constant 0 : i32
    %c0_i32_1 = arith.constant 0 : i32
    return %c0_i32, %c0_i32_0 : i32, i32
  }
  func.func @transform_2(%arg0: i32, %arg1: i32) -> (i32, i32, i32) {
    %c1_i32 = arith.constant 1 : i32
    %0 = arith.muli %arg0, %c1_i32 : i32
    %1 = arith.addi %0, %arg1 : i32
    %c0_i32 = arith.constant 0 : i32
    %c0_i32_0 = arith.constant 0 : i32
    %c0_i32_1 = arith.constant 0 : i32
    return %1, %c0_i32, %c0_i32_0 : i32, i32, i32
  }
  func.func @transform_3(%arg0: i32, %arg1: i32) -> (i32, i32, i32) {
    %c1_i32 = arith.constant 1 : i32
    %0 = arith.muli %arg0, %c1_i32 : i32
    %1 = arith.addi %0, %arg1 : i32
    %c0_i32 = arith.constant 0 : i32
    %c0_i32_0 = arith.constant 0 : i32
    %c0_i32_1 = arith.constant 0 : i32
    return %1, %c0_i32, %c0_i32_0 : i32, i32, i32
  }
  func.func @transform_4(%arg0: i32, %arg1: i32) -> (i32, i32, i32) {
    %c1_i32 = arith.constant 1 : i32
    %0 = arith.muli %arg0, %c1_i32 : i32
    %1 = arith.addi %0, %arg1 : i32
    %c0_i32 = arith.constant 0 : i32
    %c0_i32_0 = arith.constant 0 : i32
    %c0_i32_1 = arith.constant 0 : i32
    return %1, %c0_i32, %c0_i32_0 : i32, i32, i32
  }
  func.func @transform_5(%arg0: i32, %arg1: i32) -> (i32, i32, i32) {
    %c1_i32 = arith.constant 1 : i32
    %0 = arith.muli %arg0, %c1_i32 : i32
    %1 = arith.addi %0, %arg1 : i32
    %c0_i32 = arith.constant 0 : i32
    %c0_i32_0 = arith.constant 0 : i32
    %c0_i32_1 = arith.constant 0 : i32
    return %1, %c0_i32, %c0_i32_0 : i32, i32, i32
  }
  func.func @transform_6(%arg0: i32, %arg1: i32) -> (i32, i32, i32) {
    %c1_i32 = arith.constant 1 : i32
    %0 = arith.muli %arg0, %c1_i32 : i32
    %1 = arith.addi %0, %arg1 : i32
    %c0_i32 = arith.constant 0 : i32
    %c0_i32_0 = arith.constant 0 : i32
    %c0_i32_1 = arith.constant 0 : i32
    return %1, %c0_i32, %c0_i32_0 : i32, i32, i32
  }
  func.func @transform_7(%arg0: i32, %arg1: i32) -> (i32, i32) {
    %c0_i32 = arith.constant 0 : i32
    %c0_i32_0 = arith.constant 0 : i32
    %c0_i32_1 = arith.constant 0 : i32
    return %c0_i32, %c0_i32_0 : i32, i32
  }
  func.func @transform_8(%arg0: i32, %arg1: i32) -> (i32, i32, i32) {
    %c0_i32 = arith.constant 0 : i32
    %c0_i32_0 = arith.constant 0 : i32
    %c0_i32_1 = arith.constant 0 : i32
    return %arg0, %c0_i32, %c0_i32_0 : i32, i32, i32
  }
}

</mosaic_0001>

<bundles_post_ra>
// kernel: tpu_custom_call.1
= control target key start
LH: loop header
LB: loop body
LE: loop exit
PB: predicated region body
PF: predicated region fallthrough
CT: control target
= control target key end

     0   :  { %13 = vsyncpa [#allocation3], 0  ;;  %s3277_s0 = inlined_call_operand.hbm [shape: f32[8,64], index: 0, kind: input, shape index: {}]   ;;  %s3278_s1 = inlined_call_operand.hbm [shape: f32[8,32], index: 1, kind: input, shape index: {}]   ;;  %s3279_s2 = inlined_call_operand.hbm [shape: f32[4,64,512], index: 2, kind: input, shape index: {}]   ;;  %s3280_s3 = inlined_call_operand.hbm [shape: f32[4,1,512], index: 3, kind: input, shape index: {}]   ;;  %s3281_s4 = inlined_call_operand.hbm [shape: f32[4,32,512], index: 4, kind: input, shape index: {}]   ;;  %s3282_s5 = inlined_call_operand.vmem [shape: f32[4,1,512], index: 5, kind: input, shape index: {}]   ;;  %s3283_s6 = inlined_call_operand.hbm [shape: f32[4,128,128], index: 6, kind: input, shape index: {}]   ;;  %s3284_s7 = inlined_call_operand.vmem [shape: f32[1,128], index: 7, kind: input, shape index: {}]   ;;  %s3285_s8 = inlined_call_operand.hbm [shape: f32[1,8,128], index: 8, kind: output, shape index: {}]  }
   0x1   :  { %14 = vsyncpa [#allocation6], 0 }
   0x2   :  { %15 = vsyncpa [#allocation9], 0 }
   0x3   :  { %16 = vsyncpa [#allocation12], 0 }
   0x4   :  { %17 = vsyncpa [#allocation4], 0  ;;  %s2889_s27 = smov [#allocation5]   ;;  %s2890_s29 = smov [#allocation8]  }
   0x5   :  { %s34_s28 = sshll.u32 %s2889_s27, 4  ;;  %s65_s30 = sshll.u32 %s2890_s29, 4  ;;  %s35_s28 = int_to_ptr.vmem [resolvable:$true] %s34_s28  ;;  %s2950_s30 = int_to_ptr.vmem [resolvable:$true] %s65_s30 }
   0x6   :  { %s2725_s11 = scalar_lea.hbm %s3278_s1, 128 }
   0x7   :  { %p2726_p0 = scmp.ne.s32.totalorder %s3278_s1, %s2725_s11  ;;  %p2729_p1 = scmp.lt.u32.totalorder %s2725_s11, %s3278_s1 }
   0x9   :  { %p2731_p2 = pnand %p2729_p1, %p2726_p0 }
   0xb   :  { %2734 = shalt.err (!%p2731_p2)
}
   0xc   :  { %s2735_s16 = scalar_lea.vmem %s35_s28, 128  ;;  %p2740_p4 = scmp.lt.s32.totalorder %s35_s28, %s35_s28 }
   0xd   :  { %p2736_p3 = scmp.ne.s32.totalorder %s35_s28, %s2735_s16  ;;  %p2741_p5 = scmp.lt.s32.totalorder %s2735_s16, %s2735_s16 }
   0xf   :  { %p2742_p6 = por %p2741_p5, %p2740_p4 }
  0x11   :  { %p2743_p7 = pnand %p2742_p6, %p2736_p3 }
  0x13   :  { %2746 = shalt.err (!%p2743_p7)
}
  0x14   :  { %37 = dma.hbm_to_vmem [thread:$0]  %s3278_s1, 128, %s35_s28, [#allocation6]  }
  0x15   :  { %s2747_s21 = scalar_lea.hbm %s3280_s3, 256 }
  0x16   :  { %p2748_p8 = scmp.ne.s32.totalorder %s3280_s3, %s2747_s21  ;;  %p2751_p9 = scmp.lt.u32.totalorder %s2747_s21, %s3280_s3 }
  0x18   :  { %p2753_p10 = pnand %p2751_p9, %p2748_p8 }
  0x1a   :  { %2756 = shalt.err (!%p2753_p10)
}
  0x1b   :  { %s2757_s26 = scalar_lea.vmem %s2950_s30, 256  ;;  %p2762_p12 = scmp.lt.s32.totalorder %s2950_s30, %s2950_s30 }
  0x1c   :  { %p2758_p11 = scmp.ne.s32.totalorder %s2950_s30, %s2757_s26  ;;  %p2763_p13 = scmp.lt.s32.totalorder %s2757_s26, %s2757_s26 }
  0x1e   :  { %p2764_p0 = por %p2763_p13, %p2762_p12 }
  0x20   :  { %p2765_p1 = pnand %p2764_p0, %p2758_p11 }
  0x22   :  { %2768 = shalt.err (!%p2765_p1)
}
  0x23   :  { %s2891_s1 = smov 64   ;;  %s2892_s27 = smov 4  }
  0x24   :  { %71 = dma.hbm_to_vmem [thread:$0]  %s3280_s3, 256, %s2950_s30, [#allocation9], %s2891_s1, %s2891_s1, %s2892_s27  }
  0x25   :  { %s2893_s9 = smov [#allocation2]   ;;  %s2894_s11 = smov [#allocation7]  }
  0x26   :  { %s24_s10 = sshll.u32 %s2893_s9, 4  ;;  %s48_s12 = sshll.u32 %s2894_s11, 4  ;;  %s25_s10 = int_to_ptr.vmem [resolvable:$true] %s24_s10  ;;  %s2981_s12 = int_to_ptr.vmem [resolvable:$true] %s48_s12 }
  0x27   :  { %s2769_s15 = scalar_lea.hbm %s3277_s0, 128 }
  0x28   :  { %p2770_p2 = scmp.ne.s32.totalorder %s3277_s0, %s2769_s15  ;;  %p2773_p3 = scmp.lt.u32.totalorder %s2769_s15, %s3277_s0 }
  0x2a   :  { %p2775_p4 = pnand %p2773_p3, %p2770_p2 }
  0x2c   :  { %2778 = shalt.err (!%p2775_p4)
}
  0x2d   :  { %s2779_s3 = scalar_lea.vmem %s25_s10, 128  ;;  %p2784_p6 = scmp.lt.s32.totalorder %s25_s10, %s25_s10 }
  0x2e   :  { %p2780_p5 = scmp.ne.s32.totalorder %s25_s10, %s2779_s3  ;;  %p2785_p7 = scmp.lt.s32.totalorder %s2779_s3, %s2779_s3 }
  0x30   :  { %p2786_p8 = por %p2785_p7, %p2784_p6 }
  0x32   :  { %p2787_p9 = pnand %p2786_p8, %p2780_p5 }
  0x34   :  { %2790 = shalt.err (!%p2787_p9)
}
  0x35   :  { %27 = dma.hbm_to_vmem [thread:$0]  %s3277_s0, 128, %s25_s10, [#allocation3]  }
  0x36   :  { %s2791_s23 = scalar_lea.hbm %s3279_s2, 16384 }
  0x37   :  { %p2792_p10 = scmp.ne.s32.totalorder %s3279_s2, %s2791_s23  ;;  %p2795_p11 = scmp.lt.u32.totalorder %s2791_s23, %s3279_s2 }
  0x39   :  { %p2797_p12 = pnand %p2795_p11, %p2792_p10 }
  0x3b   :  { %2800 = shalt.err (!%p2797_p12)
}
  0x3c   :  { %s2801_s27 = scalar_lea.vmem %s2981_s12, 16384  ;;  %p2806_p0 = scmp.lt.s32.totalorder %s2981_s12, %s2981_s12 }
  0x3d   :  { %p2802_p13 = scmp.ne.s32.totalorder %s2981_s12, %s2801_s27  ;;  %p2807_p1 = scmp.lt.s32.totalorder %s2801_s27, %s2801_s27 }
  0x3f   :  { %p2808_p2 = por %p2807_p1, %p2806_p0 }
  0x41   :  { %p2809_p3 = pnand %p2808_p2, %p2802_p13 }
  0x43   :  { %2812 = shalt.err (!%p2809_p3)
}
  0x44   :  { %s2895_s0 = smov 512   ;;  %s2896_s28 = smov 32  }
  0x45   :  { %54 = dma.hbm_to_vmem [thread:$0]  %s3279_s2, 16384, %s2981_s12, [#allocation6], %s2895_s0, %s2895_s0, %s2896_s28  }
  0x46   :  { %s2897_s10 = smov [#allocation10]   ;;  %s2898_s13 = smov [#allocation11]  }
  0x47   :  { %s82_s11 = sshll.u32 %s2897_s10, 4  ;;  %s109_s14 = sshll.u32 %s2898_s13, 4  ;;  %s83_s11 = int_to_ptr.vmem [resolvable:$true] %s82_s11  ;;  %s3012_s14 = int_to_ptr.vmem [resolvable:$true] %s109_s14 }
  0x48   :  { %s2813_s17 = scalar_lea.hbm %s3281_s4, 8192 }
  0x49   :  { %p2814_p4 = scmp.ne.s32.totalorder %s3281_s4, %s2813_s17  ;;  %p2817_p5 = scmp.lt.u32.totalorder %s2813_s17, %s3281_s4 }
  0x4b   :  { %p2819_p6 = pnand %p2817_p5, %p2814_p4 }
  0x4d   :  { %2822 = shalt.err (!%p2819_p6)
}
  0x4e   :  { %s2823_s2 = scalar_lea.vmem %s83_s11, 8192  ;;  %p2828_p8 = scmp.lt.s32.totalorder %s83_s11, %s83_s11 }
  0x4f   :  { %p2824_p7 = scmp.ne.s32.totalorder %s83_s11, %s2823_s2  ;;  %p2829_p9 = scmp.lt.s32.totalorder %s2823_s2, %s2823_s2 }
  0x51   :  { %p2830_p10 = por %p2829_p9, %p2828_p8 }
  0x53   :  { %p2831_p11 = pnand %p2830_p10, %p2824_p7 }
  0x55   :  { %2834 = shalt.err (!%p2831_p11)
}
  0x56   :  { %88 = dma.hbm_to_vmem [thread:$0]  %s3281_s4, 8192, %s83_s11, [#allocation9], %s2895_s0, %s2895_s0, %s2896_s28  }
  0x57   :  { %s2835_s23 = scalar_lea.hbm %s3283_s6, 8192 }
  0x58   :  { %p2836_p12 = scmp.ne.s32.totalorder %s3283_s6, %s2835_s23  ;;  %p2839_p13 = scmp.lt.u32.totalorder %s2835_s23, %s3283_s6 }
  0x5a   :  { %p2841_p0 = pnand %p2839_p13, %p2836_p12 }
  0x5c   :  { %2844 = shalt.err (!%p2841_p0)
}
  0x5d   :  { %s2845_s27 = scalar_lea.vmem %s3012_s14, 8192  ;;  %p2850_p2 = scmp.lt.s32.totalorder %s3012_s14, %s3012_s14 }
  0x5e   :  { %p2846_p1 = scmp.ne.s32.totalorder %s3012_s14, %s2845_s27  ;;  %p2851_p3 = scmp.lt.s32.totalorder %s2845_s27, %s2845_s27 }
  0x60   :  { %p2852_p4 = por %p2851_p3, %p2850_p2 }
  0x62   :  { %p2853_p5 = pnand %p2852_p4, %p2846_p1 }
  0x64   :  { %2856 = shalt.err (!%p2853_p5)
}
  0x65   :  { %s2899_s4 = smov 128   ;;  %s2900_s0 = smov 8  }
  0x66   :  { %115 = dma.hbm_to_vmem [thread:$0]  %s3283_s6, 8192, %s3012_s14, [#allocation12], %s2899_s4, %s2899_s4, %s2900_s0  }
  0x67   :  { %2879 = dma.done.wait [#allocation3], 128  }
  0x68   :  { %2880 = vsyncadd [#allocation3], 4294967168 }
  0x69   :  { %2881 = dma.done.wait [#allocation6], 16512  }
  0x6a   :  { %2882 = vsyncadd [#allocation6], 4294950784 }
  0x6b   :  { %2883 = dma.done.wait [#allocation9], 8448  }
  0x6c   :  { %2884 = vsyncadd [#allocation9], 4294958848 }
  0x6d   :  { %2885 = dma.done.wait [#allocation12], 8192  }
  0x6e   :  { %2886 = vsyncadd [#allocation12], 4294959104  ;;  %v2901_v0 = vmov 0.0   ;;  %v178_v1 = vld [vmem:[#allocation7 + $0x8] sm:$0xff]  ;;  %v177_v3 = vld [vmem:[#allocation7] sm:$0xff]  ;;  %vm415_vm0 = vcmask 261120  }
  0x6f   :  { %299 = vmatprep.mubr.f32.mxu1 %v2901_v0  ;;  %483 = vmatprep.mubr.f32.mxu0 %v2901_v0  ;;  %v182_v2 = vld [vmem:[#allocation7 + $0x28] sm:$0xff]  ;;  %v181_v5 = vld [vmem:[#allocation7 + $0x20] sm:$0xff]  ;;  %v378_v14 = vld [vmem:[#allocation10 + $0x8] sm:$0xff]  ;;  %vm231_vm1 = vcmask 523264   ;;  %vm2903_vm5 = vmmov 0   ;;  %s2904_s18 = smov [#allocation13]  }
  0x70   :  { %v2403_v4 = vpack.c.bf16 %v182_v2, %v178_v1  ;;  %v186_v6 = vld [vmem:[#allocation7 + $0x48] sm:$0xff]  ;;  %v2405_v8 = vpack.c.bf16 %v181_v5, %v177_v3  ;;  %v185_v10 = vld [vmem:[#allocation7 + $0x40] sm:$0xff]  ;;  %v382_v15 = vld [vmem:[#allocation10 + $0x28] sm:$0xff]  ;;  %s2157_s19 = sshll.u32 %s2904_s18, 4  ;;  %s2158_s19 = int_to_ptr.vmem [resolvable:$true] %s2157_s19 }
  0x71   :  { %v190_v7 = vld [vmem:[#allocation7 + $0x68] sm:$0xff]  ;;  %v189_v11 = vld [vmem:[#allocation7 + $0x60] sm:$0xff]  ;;  %v2435_v17 = vpack.c.bf16 %v382_v15, %v378_v14  ;;  %v377_v19 = vld [vmem:[#allocation10] sm:$0xff]  ;;  %s2857_s3 = scalar_lea.vmem %s2158_s19, 128  ;;  %p2862_p7 = scmp.lt.s32.totalorder %s2158_s19, %s2158_s19 }
  0x72   :  { %v2407_v9 = vpack.c.bf16 %v190_v7, %v186_v6  ;;  %v194_v12 = vld [vmem:[#allocation7 + $0x88] sm:$0xff]  ;;  %2404 = vmatprep.subr.bf16.mxu1 %v2403_v4  ;;  %v2409_v16 = vpack.c.bf16 %v189_v11, %v185_v10  ;;  %v193_v18 = vld [vmem:[#allocation7 + $0x80] sm:$0xff]  ;;  %v381_v22 = vld [vmem:[#allocation10 + $0x20] sm:$0xff]  ;;  %p2858_p6 = scmp.ne.s32.totalorder %s2158_s19, %s2857_s3  ;;  %p2863_p8 = scmp.lt.s32.totalorder %s2857_s3, %s2857_s3 }
  0x73   :  { %v198_v13 = vld [vmem:[#allocation7 + $0xa8] sm:$0xff]  ;;  %2406 = vmatpush1.bf16.msra.mxu1 %v2405_v8  ;;  %v197_v21 = vld [vmem:[#allocation7 + $0xa0] sm:$0xff]  ;;  %2436 = vmatprep.subr.bf16.mxu0 %v2435_v17  ;;  %v2437_v24 = vpack.c.bf16 %v381_v22, %v377_v19  ;;  %v386_v26 = vld [vmem:[#allocation10 + $0x48] sm:$0xff]  ;;  %v2902_v19 = vmov 0.0|0.0  }
  0x74   :  { %2408 = vmatprep.subr.bf16.mxu1 %v2407_v9  ;;  %v2411_v20 = vpack.c.bf16 %v198_v13, %v194_v12  ;;  %v202_v23 = vld [vmem:[#allocation7 + $0xc8] sm:$0xff]  ;;  %v390_v27 = vld [vmem:[#allocation10 + $0x68] sm:$0xff]  ;;  %v385_v29 = vld [vmem:[#allocation10 + $0x40] sm:$0xff]  ;;  %v2413_v31 = vpack.c.bf16 %v197_v21, %v193_v18  ;;  %p2864_p9 = por %p2863_p8, %p2862_p7 }
  0x75   :  { %v206_v25 = vld [vmem:[#allocation7 + $0xe8] sm:$0xff]  ;;  %v2439_v28 = vpack.c.bf16 %v390_v27, %v386_v26  ;;  %v389_v30 = vld [vmem:[#allocation10 + $0x60] sm:$0xff]  ;;  %2438 = vmatpush1.bf16.msra.mxu0 %v2437_v24  ;;  %v201_v34 = vld [vmem:[#allocation7 + $0xc0] sm:$0xff] }
  0x76   :  { %v2441_v32 = vpack.c.bf16 %v389_v30, %v385_v29  ;;  %v2415_v33 = vpack.c.bf16 %v206_v25, %v202_v23  ;;  %v205_v35 = vld [vmem:[#allocation7 + $0xe0] sm:$0xff]  ;;  %v180_v36 = vld [vmem:[#allocation7 + $0x18] sm:$0xff]  ;;  %v179_v41 = vld [vmem:[#allocation7 + $0x10] sm:$0xff]  ;;  %p2865_p10 = pnand %p2864_p9, %p2858_p6 }
  0x77   :  { %2410 = vmatpush1.bf16.msra.mxu1 %v2409_v16  ;;  %2440 = vmatprep.subr.bf16.mxu0 %v2439_v28  ;;  %v184_v37 = vld [vmem:[#allocation7 + $0x38] sm:$0xff]  ;;  %v2417_v38 = vpack.c.bf16 %v205_v35, %v201_v34  ;;  %v183_v42 = vld [vmem:[#allocation7 + $0x30] sm:$0xff]  ;;  %v380_v62 = vld [vmem:[#allocation10 + $0x18] sm:$0xff] }
  0x78   :  { %2412 = vmatprep.subr.bf16.mxu1 %v2411_v20  ;;  %v3045_v39 = vld [vmem:[#allocation5] sm:$0xff]  ;;  %v2419_v40 = vpack.c.bf16 %v184_v37, %v180_v36  ;;  %v3049_v45 = vld [vmem:[#allocation2] sm:$0xff]  ;;  %v2421_v46 = vpack.c.bf16 %v183_v42, %v179_v41  ;;  %v384_v63 = vld [vmem:[#allocation10 + $0x38] sm:$0xff] }
  0x79   :  { %2442 = vmatpush1.bf16.msra.mxu0 %v2441_v32  ;;  %v188_v43 = vld [vmem:[#allocation7 + $0x58] sm:$0xff]  ;;  %v187_v48 = vld [vmem:[#allocation7 + $0x50] sm:$0xff]  ;;  %v2443_v2 = vpack.c.bf16 %v384_v63, %v380_v62  ;;  %v379_v3 = vld [vmem:[#allocation10 + $0x10] sm:$0xff] }
  0x7a   :  { %v192_v44 = vld [vmem:[#allocation7 + $0x78] sm:$0xff]  ;;  %v191_v49 = vld [vmem:[#allocation7 + $0x70] sm:$0xff]  ;;  %v383_v4 = vld [vmem:[#allocation10 + $0x30] sm:$0xff]  ;;  %2451 = vmatprep.subr.bf16.mxu0 %v2902_v19 }
  0x7b   :  { %2414 = vmatpush1.bf16.msra.mxu1 %v2413_v31  ;;  %v2423_v47 = vpack.c.bf16 %v192_v44, %v188_v43  ;;  %v196_v50 = vld [vmem:[#allocation7 + $0x98] sm:$0xff]  ;;  %v2425_v52 = vpack.c.bf16 %v191_v49, %v187_v48  ;;  %v195_v54 = vld [vmem:[#allocation7 + $0x90] sm:$0xff]  ;;  %v388_v5 = vld [vmem:[#allocation10 + $0x58] sm:$0xff]  ;;  %v2445_v7 = vpack.c.bf16 %v383_v4, %v379_v3  ;;  %v211_v3 = vlaneseq }
  0x7c   :  { %2416 = vmatprep.subr.bf16.mxu1 %v2415_v33  ;;  %2178 = vmatmul.mubr.msk.f32.vlgmr.msra.gmra.mrb[0].mxu0 %vm415_vm0, %v3045_v39  ;;  %v200_v51 = vld [vmem:[#allocation7 + $0xb8] sm:$0xff]  ;;  %v199_v55 = vld [vmem:[#allocation7 + $0xb0] sm:$0xff]  ;;  %v392_v6 = vld [vmem:[#allocation10 + $0x78] sm:$0xff] }
  0x7d   :  { %v2427_v53 = vpack.c.bf16 %v200_v51, %v196_v50  ;;  %v204_v56 = vld [vmem:[#allocation7 + $0xd8] sm:$0xff]  ;;  %v2429_v58 = vpack.c.bf16 %v199_v55, %v195_v54  ;;  %v203_v60 = vld [vmem:[#allocation7 + $0xd0] sm:$0xff]  ;;  %v2447_v8 = vpack.c.bf16 %v392_v6, %v388_v5  ;;  %v387_v9 = vld [vmem:[#allocation10 + $0x50] sm:$0xff]  ;;  %v212_v4 = vshrl.u32 %v211_v3, 7  ;;  %2295 = vmatprep.mubr.msk.f32.mxu0 %vm2903_vm5, %v2901_v0 }
  0x7e   :  { %v208_v57 = vld [vmem:[#allocation7 + $0xf8] sm:$0xff]  ;;  %v207_v61 = vld [vmem:[#allocation7 + $0xf0] sm:$0xff]  ;;  %v391_v10 = vld [vmem:[#allocation10 + $0x70] sm:$0xff] }
  0x7f   :  { %2418 = vmatpush1.bf16.msra.mxu1 %v2417_v38  ;;  %v2431_v59 = vpack.c.bf16 %v208_v57, %v204_v56  ;;  %v2433_v1 = vpack.c.bf16 %v207_v61, %v203_v60  ;;  %v2449_v11 = vpack.c.bf16 %v391_v10, %v387_v9  ;;  %v674_v12 = vld [vmem:[#allocation7 + $0x108] sm:$0xff]  ;;  %v673_v14 = vld [vmem:[#allocation7 + $0x100] sm:$0xff]  ;;  %v585_v24 = vld [vmem:[#allocation11] sm:$0xff]  ;;  %v3069_v5 = vsub.s32 0, %v212_v4 }
  0x80   :  { %2420 = vmatprep.subr.bf16.mxu1 %v2419_v40  ;;  %v678_v13 = vld [vmem:[#allocation7 + $0x128] sm:$0xff]  ;;  %v677_v16 = vld [vmem:[#allocation7 + $0x120] sm:$0xff]  ;;  %v586_v25 = vld [vmem:[#allocation11 + $0x8] sm:$0xff] }
  0x81   :  { %v2475_v15 = vpack.c.bf16 %v678_v13, %v674_v12  ;;  %v682_v17 = vld [vmem:[#allocation7 + $0x148] sm:$0xff]  ;;  %v2477_v20 = vpack.c.bf16 %v677_v16, %v673_v14  ;;  %v681_v22 = vld [vmem:[#allocation7 + $0x140] sm:$0xff]  ;;  %v2452_v29 = vpack.c.bf16 %v586_v25, %v585_v24  ;;  %v589_v38 = vld [vmem:[#allocation11 + $0x20] sm:$0xff] }
  0x82   :  { %2176 = vmatmul.mubr.msk.f32.vlgmr.msra.gmra.mrb[0].mxu1 %vm231_vm1, %v3049_v45  ;;  %v686_v18 = vld [vmem:[#allocation7 + $0x168] sm:$0xff]  ;;  %v685_v23 = vld [vmem:[#allocation7 + $0x160] sm:$0xff]  ;;  %v590_v40 = vld [vmem:[#allocation11 + $0x28] sm:$0xff] }
  0x83   :  { %2422 = vmatpush1.bf16.msra.mxu1 %v2421_v46  ;;  %370 = vmatprep.mubr.f32.mxu1 %v2901_v0  ;;  %v2479_v21 = vpack.c.bf16 %v686_v18, %v682_v17  ;;  %v690_v26 = vld [vmem:[#allocation7 + $0x188] sm:$0xff]  ;;  %v2481_v28 = vpack.c.bf16 %v685_v23, %v681_v22  ;;  %v587_v30 = vld [vmem:[#allocation11 + $0x10] sm:$0xff]  ;;  %v2458_v46 = vpack.c.bf16 %v590_v40, %v589_v38  ;;  %v680_v48 = vld [vmem:[#allocation7 + $0x138] sm:$0xff] }
  0x84   :  { %2424 = vmatprep.subr.bf16.mxu1 %v2423_v47  ;;  %v694_v27 = vld [vmem:[#allocation7 + $0x1a8] sm:$0xff]  ;;  %v689_v32 = vld [vmem:[#allocation7 + $0x180] sm:$0xff]  ;;  %2453 = vmatpush3.bf16.msra.mxu0 %v2452_v29  ;;  %v676_v47 = vld [vmem:[#allocation7 + $0x118] sm:$0xff] }
  0x85   :  { %v2483_v31 = vpack.c.bf16 %v694_v27, %v690_v26  ;;  %v693_v33 = vld [vmem:[#allocation7 + $0x1a0] sm:$0xff]  ;;  %v588_v34 = vld [vmem:[#allocation11 + $0x18] sm:$0xff]  ;;  %2454 = vmatprep.subr.bf16.mxu0 %v2902_v19  ;;  %v679_v54 = vld [vmem:[#allocation7 + $0x130] sm:$0xff]  ;;  %v3080_v26 = vsub.s32 2, %v212_v4 }
  0x86   :  { %v2455_v35 = vpack.c.bf16 %v588_v34, %v587_v30  ;;  %v698_v36 = vld [vmem:[#allocation7 + $0x1c8] sm:$0xff]  ;;  %v2485_v41 = vpack.c.bf16 %v693_v33, %v689_v32  ;;  %v697_v43 = vld [vmem:[#allocation7 + $0x1c0] sm:$0xff]  ;;  %v684_v56 = vld [vmem:[#allocation7 + $0x158] sm:$0xff] }
  0x87   :  { %2426 = vmatpush1.bf16.msra.mxu1 %v2425_v52  ;;  %v702_v37 = vld [vmem:[#allocation7 + $0x1e8] sm:$0xff]  ;;  %v701_v44 = vld [vmem:[#allocation7 + $0x1e0] sm:$0xff]  ;;  %v2491_v52 = vpack.c.bf16 %v680_v48, %v676_v47  ;;  %v688_v57 = vld [vmem:[#allocation7 + $0x178] sm:$0xff] }
  0x88   :  { %2428 = vmatprep.subr.bf16.mxu1 %v2427_v53  ;;  %v2487_v42 = vpack.c.bf16 %v702_v37, %v698_v36  ;;  %2456 = vmatpush3.bf16.msra.mxu0 %v2455_v35  ;;  %v591_v49 = vld [vmem:[#allocation11 + $0x30] sm:$0xff]  ;;  %v592_v50 = vld [vmem:[#allocation11 + $0x38] sm:$0xff]  ;;  %v2489_v51 = vpack.c.bf16 %v701_v44, %v697_v43  ;;  %v675_v53 = vld [vmem:[#allocation7 + $0x110] sm:$0xff]  ;;  %v2495_v61 = vpack.c.bf16 %v688_v57, %v684_v56 }
  0x89   :  { %2457 = vmatprep.subr.bf16.mxu0 %v2902_v19  ;;  %v2461_v55 = vpack.c.bf16 %v592_v50, %v591_v49  ;;  %v2493_v60 = vpack.c.bf16 %v679_v54, %v675_v53  ;;  %v683_v62 = vld [vmem:[#allocation7 + $0x150] sm:$0xff]  ;;  %v393_v6 = vld [vmem:[%s3282_s5] sm:$0xf]  ;;  %v692_v54 = vld [vmem:[#allocation7 + $0x198] sm:$0xff] }
  0x8a   :  { %v687_v63 = vld [vmem:[#allocation7 + $0x170] sm:$0xff]  ;;  %v398_v9 = vrot.slane %v393_v6, %v3069_v5  ;;  %v406_v30 = vrot.slane %v393_v6, %v3080_v26 }
  0x8b   :  { %2430 = vmatpush1.bf16.msra.mxu1 %v2429_v58  ;;  %v593_v58 = vld [vmem:[#allocation11 + $0x40] sm:$0xff] }
  0x8c   :  { %2432 = vmatprep.subr.bf16.mxu1 %v2431_v59  ;;  %2459 = vmatpush3.bf16.msra.mxu0 %v2458_v46  ;;  %v594_v59 = vld [vmem:[#allocation11 + $0x48] sm:$0xff]  ;;  %v691_v57 = vld [vmem:[#allocation7 + $0x190] sm:$0xff] }
  0x8d   :  { %2460 = vmatprep.subr.bf16.mxu0 %v2902_v19 }
  0x8f   :  { %2434 = vmatpush1.bf16.msra.mxu1 %v2433_v1  ;;  %v2464_v1 = vpack.c.bf16 %v594_v59, %v593_v58  ;;  %v695_v58 = vld [vmem:[#allocation7 + $0x1b0] sm:$0xff] }
  0x90   :  { %2444 = vmatprep.subr.bf16.mxu1 %v2443_v2  ;;  %2462 = vmatpush3.bf16.msra.mxu0 %v2461_v55  ;;  %v2497_v2 = vpack.c.bf16 %v687_v63, %v683_v62  ;;  %v696_v55 = vld [vmem:[#allocation7 + $0x1b8] sm:$0xff]  ;;  %v2501_v59 = vpack.c.bf16 %v695_v58, %v691_v57 }
  0x91   :  { %2463 = vmatprep.subr.bf16.mxu0 %v2902_v19  ;;  %v2499_v56 = vpack.c.bf16 %v696_v55, %v692_v54  ;;  %v700_v63 = vld [vmem:[#allocation7 + $0x1d8] sm:$0xff]  ;;  %v3122_v54 = vld [vmem:[%s3282_s5 + $0x4] sm:$0xf] }
  0x92   :  { %2177 = vmatmul.mubr.msk.f32.vlgmr.msra.gmra.mrb[2].mxu1 %vm231_vm1, %v3049_v45 }
  0x93   :  { %2446 = vmatpush1.bf16.msra.mxu1 %v2445_v7  ;;  %554 = vmatprep.mubr.f32.mxu1 %v2901_v0  ;;  %v3074_v7 = vsub.s32 1, %v212_v4 }
  0x94   :  { %2448 = vmatprep.subr.bf16.mxu1 %v2447_v8  ;;  %2465 = vmatpush3.bf16.msra.mxu0 %v2464_v1  ;;  %v209_v8 = vld [vmem:[#allocation8] sm:$0xf]  ;;  %v704_v1 = vld [vmem:[#allocation7 + $0x1f8] sm:$0xff] }
  0x95   :  { %2466 = vmatprep.subr.bf16.mxu0 %v2902_v19  ;;  %v214_v12 = vrot.slane %v209_v8, %v3069_v5  ;;  %v218_v14 = vrot.slane %v209_v8, %v3074_v7  ;;  %v222_v29 = vrot.slane %v209_v8, %v3080_v26  ;;  %v2503_v3 = vpack.c.bf16 %v704_v1, %v700_v63 }
  0x97   :  { %2450 = vmatpush1.bf16.msra.mxu1 %v2449_v11  ;;  %v402_v11 = vrot.slane %v393_v6, %v3074_v7 }
  0x98   :  { %2476 = vmatprep.subr.bf16.mxu1 %v2475_v15 }
  0x9a   :  { %2179 = vmatmul.mubr.msk.f32.vlgmr.msra.gmra.mrb[4].mxu1 %vm415_vm0, %v3045_v39 }
  0x9b   :  { %792 = vmatprep.mubr.f32.mxu1 %v2901_v0  ;;  %2478 = vmatpush1.bf16.msra.mxu1 %v2477_v20 }
  0x9c   :  { %2480 = vmatprep.subr.bf16.mxu1 %v2479_v21 }
  0x9f   :  { %2482 = vmatpush1.bf16.msra.mxu1 %v2481_v28  ;;  %v3082_v28 = vsub.s32 3, %v212_v4  ;;  %v703_v4 = vld [vmem:[#allocation7 + $0x1f0] sm:$0xff] }
  0xa0   :  { %2484 = vmatprep.subr.bf16.mxu1 %v2483_v31 }
  0xa1   :  { %v226_v31 = vrot.slane %v209_v8, %v3082_v28  ;;  %v410_v32 = vrot.slane %v393_v6, %v3082_v28  ;;  %v597_v6 = vld [vmem:[#allocation11 + $0x60] sm:$0xff]  ;;  %v598_v8 = vld [vmem:[#allocation11 + $0x68] sm:$0xff]  ;;  %v905_v58 = vrot.slane %v3122_v54, %v3082_v28 }
  0xa3   :  { %2486 = vmatpush1.bf16.msra.mxu1 %v2485_v41 }
  0xa4   :  { %2488 = vmatprep.subr.bf16.mxu1 %v2487_v42 }
  0xa7   :  { %2490 = vmatpush1.bf16.msra.mxu1 %v2489_v51 }
  0xa8   :  { %2492 = vmatprep.subr.bf16.mxu1 %v2491_v52 }
  0xaa   :  { %2180 = vmatmul.mubr.msk.f32.vlgmr.msra.gmra.mrb[6].mxu1 %vm231_vm1, %v3049_v45 }
  0xab   :  { %2494 = vmatpush1.bf16.msra.mxu1 %v2493_v60  ;;  %863 = vmatprep.mubr.f32.mxu1 %v2901_v0  ;;  %v595_v60 = vld [vmem:[#allocation11 + $0x50] sm:$0xff] }
  0xac   :  { %2496 = vmatprep.subr.bf16.mxu1 %v2495_v61  ;;  %v596_v61 = vld [vmem:[#allocation11 + $0x58] sm:$0xff] }
  0xad   :  { %v2467_v62 = vpack.c.bf16 %v596_v61, %v595_v60 }
  0xaf   :  { %2498 = vmatpush1.bf16.msra.mxu1 %v2497_v2  ;;  %v699_v2 = vld [vmem:[#allocation7 + $0x1d0] sm:$0xff]  ;;  %2468 = vmatpush3.bf16.msra.mxu0 %v2467_v62 }
  0xb0   :  { %2500 = vmatprep.subr.bf16.mxu1 %v2499_v56  ;;  %2469 = vmatprep.subr.bf16.mxu0 %v2902_v19  ;;  %v901_v56 = vrot.slane %v3122_v54, %v3080_v26 }
  0xb3   :  { %2502 = vmatpush1.bf16.msra.mxu1 %v2501_v59 }
  0xb4   :  { %2504 = vmatprep.subr.bf16.mxu1 %v2503_v3  ;;  %v1170_v3 = vld [vmem:[#allocation7 + $0x228] sm:$0xff] }
 0x14f   :  { %v485_v10 = vpop.f32.mrb[0].mxu0 }
 0x150   :  { %v487_v13 = vpop.f32.mrb[1].mxu0  ;;  %v486_v15 = vadd.f32 %v485_v10, %v398_v9  ;;  %v2505_v9 = vpack.c.bf16 %v703_v4, %v699_v2  ;;  %v2470_v10 = vpack.c.bf16 %v598_v8, %v597_v6  ;;  %v1166_v2 = vld [vmem:[#allocation7 + $0x208] sm:$0xff]  ;;  %v1165_v4 = vld [vmem:[#allocation7 + $0x200] sm:$0xff] }
 0x151   :  { %v488_v17 = vadd.f32 %v487_v13, %v402_v11  ;;  %v874_v11 = vld [vmem:[#allocation10 + $0x98] sm:$0xff]  ;;  %v873_v13 = vld [vmem:[#allocation10 + $0x90] sm:$0xff]  ;;  %v2547_v6 = vpack.c.bf16 %v1170_v3, %v1166_v2 }
 0x152   :  { %2506 = vmatpush1.bf16.msra.mxu1 %v2505_v9  ;;  %2471 = vmatpush3.bf16.msra.mxu0 %v2470_v10  ;;  %v1169_v8 = vld [vmem:[#allocation7 + $0x220] sm:$0xff]  ;;  %v1174_v9 = vld [vmem:[#allocation7 + $0x248] sm:$0xff] }
 0x153   :  { %2472 = vmatprep.subr.bf16.mxu0 %v2902_v19  ;;  %v1178_v10 = vld [vmem:[#allocation7 + $0x268] sm:$0xff] }
 0x155   :  { %v301_v16 = vpop.f32.mrb[0].mxu1  ;;  %2181 = vmatmul.mubr.msk.f32.vlgmr.msra.gmra.mrb[8].mxu1 %vm231_vm1, %v3049_v45 }
 0x156   :  { %v302_v18 = vadd.f32 %v301_v16, %v214_v12  ;;  %v303_v20 = vpop.f32.mrb[1].mxu1  ;;  %v878_v12 = vld [vmem:[#allocation10 + $0xb8] sm:$0xff]  ;;  %v599_v16 = vld [vmem:[#allocation11 + $0x70] sm:$0xff]  ;;  %1045 = vmatprep.mubr.f32.mxu1 %v2901_v0 }
 0x157   :  { %v304_v21 = vadd.f32 %v303_v20, %v218_v14  ;;  %v2515_v14 = vpack.c.bf16 %v878_v12, %v874_v11  ;;  %v882_v20 = vld [vmem:[#allocation10 + $0xd8] sm:$0xff]  ;;  %v2549_v11 = vpack.c.bf16 %v1169_v8, %v1165_v4  ;;  %v2551_v12 = vpack.c.bf16 %v1178_v10, %v1174_v9 }
 0x158   :  { %v561_v22 = vmul.f32 %v486_v15, %v302_v18  ;;  %v877_v15 = vld [vmem:[#allocation10 + $0xb0] sm:$0xff]  ;;  %v893_v8 = vrot.slane %v3122_v54, %v3069_v5  ;;  %v897_v10 = vrot.slane %v3122_v54, %v3074_v7 }
 0x159   :  { %v562_v23 = vmul.f32 %v488_v17, %v304_v21  ;;  %v600_v17 = vld [vmem:[#allocation11 + $0x78] sm:$0xff]  ;;  %v2517_v18 = vpack.c.bf16 %v877_v15, %v873_v13  ;;  %2516 = vmatprep.subr.bf16.mxu1 %v2515_v14  ;;  %v1173_v13 = vld [vmem:[#allocation7 + $0x240] sm:$0xff]  ;;  %v1077_v15 = vld [vmem:[#allocation11 + $0x80] sm:$0xff] }
 0x15a   :  { %v886_v21 = vld [vmem:[#allocation10 + $0xf8] sm:$0xff]  ;;  %v1177_v14 = vld [vmem:[#allocation7 + $0x260] sm:$0xff] }
 0x15b   :  { %v565_v24 = vadd.f32 %v562_v23, %v561_v22  ;;  %v872_v22 = vld [vmem:[#allocation10 + $0x88] sm:$0xff]  ;;  %v2473_v23 = vpack.c.bf16 %v600_v17, %v599_v16  ;;  %2518 = vmatpush1.bf16.msra.mxu1 %v2517_v18  ;;  %v1182_v17 = vld [vmem:[#allocation7 + $0x288] sm:$0xff] }
 0x15c   :  { %v1078_v16 = vld [vmem:[#allocation11 + $0x88] sm:$0xff]  ;;  %v1186_v18 = vld [vmem:[#allocation7 + $0x2a8] sm:$0xff] }
 0x15d   :  { %2474 = vmatpush3.bf16.msra.mxu0 %v2473_v23  ;;  %v2555_v23 = vpack.c.bf16 %v1186_v18, %v1182_v17 }
 0x165   :  { %v372_v25 = vpop.f32.mrb[2].mxu1 }
 0x166   :  { %v374_v27 = vpop.f32.mrb[3].mxu1  ;;  %v373_v34 = vadd.f32 %v372_v25, %v222_v29  ;;  %v876_v25 = vld [vmem:[#allocation10 + $0xa8] sm:$0xff]  ;;  %v885_v29 = vld [vmem:[#allocation10 + $0xf0] sm:$0xff] }
 0x167   :  { %v375_v37 = vadd.f32 %v374_v27, %v226_v31  ;;  %v881_v27 = vld [vmem:[#allocation10 + $0xd0] sm:$0xff] }
 0x168   :  { %v2521_v31 = vpack.c.bf16 %v885_v29, %v881_v27  ;;  %v1080_v27 = vld [vmem:[#allocation11 + $0x98] sm:$0xff] }
 0x16d   :  { %v556_v33 = vpop.f32.mrb[4].mxu1 }
 0x16e   :  { %v557_v35 = vadd.f32 %v556_v33, %v406_v30  ;;  %v558_v36 = vpop.f32.mrb[5].mxu1  ;;  %v2507_v30 = vpack.c.bf16 %v876_v25, %v872_v22  ;;  %v1079_v22 = vld [vmem:[#allocation11 + $0x90] sm:$0xff] }
 0x16f   :  { %v559_v38 = vadd.f32 %v558_v36, %v410_v32  ;;  %v871_v36 = vld [vmem:[#allocation10 + $0x80] sm:$0xff]  ;;  %v1185_v25 = vld [vmem:[#allocation7 + $0x2a0] sm:$0xff]  ;;  %v2527_v29 = vpack.c.bf16 %v1080_v27, %v1079_v22 }
 0x170   :  { %v563_v40 = vmul.f32 %v557_v35, %v373_v34  ;;  %2508 = vmatprep.subr.bf16.mxu0 %v2507_v30  ;;  %v1190_v30 = vld [vmem:[#allocation7 + $0x2c8] sm:$0xff] }
 0x171   :  { %v564_v41 = vmul.f32 %v559_v38, %v375_v37  ;;  %v875_v37 = vld [vmem:[#allocation10 + $0xa0] sm:$0xff]  ;;  %v880_v38 = vld [vmem:[#allocation10 + $0xc8] sm:$0xff] }
 0x172   :  { %v566_v42 = vadd.f32 %v565_v24, %v563_v40  ;;  %v2519_v24 = vpack.c.bf16 %v886_v21, %v882_v20  ;;  %v884_v40 = vld [vmem:[#allocation10 + $0xe8] sm:$0xff]  ;;  %v2553_v20 = vpack.c.bf16 %v1177_v14, %v1173_v13  ;;  %v2524_v21 = vpack.c.bf16 %v1078_v16, %v1077_v15 }
 0x174   :  { %v567_v43 = vadd.f32 %v566_v42, %v564_v41  ;;  %2520 = vmatprep.subr.bf16.mxu1 %v2519_v24  ;;  %v2509_v42 = vpack.c.bf16 %v875_v37, %v871_v36  ;;  %v1181_v24 = vld [vmem:[#allocation7 + $0x280] sm:$0xff] }
 0x175   :  { %2522 = vmatpush1.bf16.msra.mxu1 %v2521_v31  ;;  %v1194_v31 = vld [vmem:[#allocation7 + $0x2e8] sm:$0xff]  ;;  %v2557_v36 = vpack.c.bf16 %v1185_v25, %v1181_v24 }
 0x176   :  { %v568_v44 = vand.u32 2147483647, %v567_v43  ;;  %vm576_vm4 = vcmp.lt.f32.partialorder %v567_v43, 0.0  ;;  %2548 = vmatprep.subr.bf16.mxu1 %v2547_v6  ;;  %v2559_v37 = vpack.c.bf16 %v1194_v31, %v1190_v30  ;;  %v1188_v30 = vld [vmem:[#allocation7 + $0x2b8] sm:$0xff]  ;;  %v1183_v31 = vld [vmem:[#allocation7 + $0x290] sm:$0xff] }
 0x178   :  { %2707 = vrsqrt.f32 %v568_v44  ;;  %vm571_vm2 = vcmp.eq.f32.partialorder %v568_v44, inf  ;;  %v574_v48 = vand.u32 2147483648, %v568_v44  ;;  %vm573_vm3 = vcmp.eq.f32.partialorder %v568_v44, 0.0  ;;  %2184 = vmatmul.mubr.msk.f32.vlgmr.msra.gmra.mrb[10].mxu1 %vm415_vm0, %v3045_v39 }
 0x179   :  { %1284 = vmatprep.mubr.f32.mxu1 %v2901_v0  ;;  %2550 = vmatpush1.bf16.msra.mxu1 %v2549_v11 }
 0x17a   :  { %2552 = vmatprep.subr.bf16.mxu1 %v2551_v12 }
 0x17d   :  { %v3102_v32 = vpop.f32.mrb[6].mxu1  ;;  %2554 = vmatpush1.bf16.msra.mxu1 %v2553_v20 }
 0x17e   :  { %v3104_v33 = vpop.f32.mrb[7].mxu1  ;;  %2556 = vmatprep.subr.bf16.mxu1 %v2555_v23 }
 0x181   :  { %2558 = vmatpush1.bf16.msra.mxu1 %v2557_v36  ;;  %v1087_v36 = vld [vmem:[#allocation11 + $0xd0] sm:$0xff] }
 0x182   :  { %v2708_v46 = vpop.eup %2707  ;;  %2560 = vmatprep.subr.bf16.mxu1 %v2559_v37  ;;  %v1088_v37 = vld [vmem:[#allocation11 + $0xd8] sm:$0xff] }
 0x183   :  { %v570_v47 = vmul.f32 %v2708_v46, %v568_v44  ;;  %v879_v46 = vld [vmem:[#allocation10 + $0xc0] sm:$0xff] }
 0x185   :  { %v572_v49 = vsel %vm571_vm2, %v568_v44, %v570_v47  ;;  %v2511_v44 = vpack.c.bf16 %v884_v40, %v880_v38  ;;  %v883_v47 = vld [vmem:[#allocation10 + $0xe0] sm:$0xff]  ;;  %v1189_v38 = vld [vmem:[#allocation7 + $0x2c0] sm:$0xff] }
 0x186   :  { %v575_v50 = vsel %vm573_vm3, %v574_v48, %v572_v49  ;;  %v2513_v48 = vpack.c.bf16 %v883_v47, %v879_v46  ;;  %v3113_v49 = vld [vmem:[#allocation8 + $0x4] sm:$0xf]  ;;  %v1084_v46 = vld [vmem:[#allocation11 + $0xb8] sm:$0xff] }
 0x187   :  { %v577_v51 = vsub.f32 0.0, %v575_v50  ;;  %v1193_v40 = vld [vmem:[#allocation7 + $0x2e0] sm:$0xff]  ;;  %v711_v6 = vrot.slane %v3113_v49, %v3069_v5  ;;  %v715_v9 = vrot.slane %v3113_v49, %v3074_v7 }
 0x188   :  { %v2561_v47 = vpack.c.bf16 %v1193_v40, %v1189_v38  ;;  %v2539_v38 = vpack.c.bf16 %v1088_v37, %v1087_v36  ;;  %v1192_v40 = vld [vmem:[#allocation7 + $0x2d8] sm:$0xff] }
 0x189   :  { %v3088_v52 = vsel %vm576_vm4, %v577_v51, %v575_v50  ;;  %v719_v50 = vrot.slane %v3113_v49, %v3080_v26  ;;  %v795_v12 = vadd.f32 %v3102_v32, %v711_v6  ;;  %v797_v15 = vadd.f32 %v3104_v33, %v715_v9  ;;  %v1368_v6 = vld [vmem:[#allocation10 + $0x128] sm:$0xff]  ;;  %v1377_v9 = vld [vmem:[#allocation10 + $0x170] sm:$0xff] }
 0x18a   :  { %v579_v53 = vmul.f32 %v3088_v52, %v3088_v52  ;;  %2562 = vmatpush1.bf16.msra.mxu1 %v2561_v47  ;;  %v1090_v47 = vld [vmem:[#allocation11 + $0xe8] sm:$0xff] }
 0x18c   :  { %580 = vadd.xlane.f32.xlu0 %v579_v53 }
 0x18d   :  { %2185 = vmatmul.mubr.msk.f32.vlgmr.msra.gmra.mrb[12].mxu1 %vm231_vm1, %v3049_v45 }
 0x18e   :  { %1355 = vmatprep.mubr.f32.mxu1 %v2901_v0 }
 0x219   :  { %v581_v34 = vpop.xlane.xlu0 %580 }
 0x21a   :  { %v582_v35 = vmax.f32 %v581_v34, 1e-24  ;;  %v1081_v34 = vld [vmem:[#allocation11 + $0xa0] sm:$0xff] }
 0x21c   :  { %2709 = vrsqrt.f32 %v582_v35  ;;  %v1082_v35 = vld [vmem:[#allocation11 + $0xa8] sm:$0xff] }
 0x226   :  { %v2710_v41 = vpop.eup %2709 }
 0x227   :  { %v584_v43 = vmul.f32 %v2710_v41, %v3088_v52  ;;  %v723_v52 = vrot.slane %v3113_v49, %v3082_v28  ;;  %v2530_v41 = vpack.c.bf16 %v1082_v35, %v1081_v34  ;;  %v1187_v34 = vld [vmem:[#allocation7 + $0x2b0] sm:$0xff] }
 0x228   :  { %v865_v51 = vpop.f32.mrb[8].mxu1  ;;  %v2573_v35 = vpack.c.bf16 %v1187_v34, %v1183_v31 }
 0x229   :  { %2296 = vmatmul.mubr.f32.vlgmr.msra.gmra.mrb[2].mxu0 %v584_v43  ;;  %v867_v53 = vpop.f32.mrb[9].mxu1  ;;  %v866_v55 = vadd.f32 %v865_v51, %v719_v50  ;;  %v1172_v43 = vld [vmem:[#allocation7 + $0x238] sm:$0xff]  ;;  %v1167_v50 = vld [vmem:[#allocation7 + $0x210] sm:$0xff] }
 0x22a   :  { %2510 = vmatpush1.bf16.msra.mxu0 %v2509_v42  ;;  %974 = vmatprep.mubr.f32.mxu0 %v2901_v0  ;;  %v868_v59 = vadd.f32 %v867_v53, %v723_v52  ;;  %v1168_v42 = vld [vmem:[#allocation7 + $0x218] sm:$0xff]  ;;  %v1171_v51 = vld [vmem:[#allocation7 + $0x230] sm:$0xff] }
 0x22b   :  { %2512 = vmatprep.subr.bf16.mxu0 %v2511_v44  ;;  %v1083_v44 = vld [vmem:[#allocation11 + $0xb0] sm:$0xff]  ;;  %v1176_v53 = vld [vmem:[#allocation7 + $0x258] sm:$0xff] }
 0x22c   :  { %v2533_v52 = vpack.c.bf16 %v1084_v46, %v1083_v44  ;;  %v1195_v44 = vld [vmem:[#allocation7 + $0x2f0] sm:$0xff] }
 0x22d   :  { %v1089_v46 = vld [vmem:[#allocation11 + $0xe0] sm:$0xff] }
 0x22e   :  { %2514 = vmatpush1.bf16.msra.mxu0 %v2513_v48  ;;  %v2563_v48 = vpack.c.bf16 %v1172_v43, %v1168_v42  ;;  %v1191_v42 = vld [vmem:[#allocation7 + $0x2d0] sm:$0xff] }
 0x22f   :  { %2523 = vmatprep.subr.bf16.mxu0 %v2902_v19 }
 0x230   :  { %2564 = vmatprep.subr.bf16.mxu1 %v2563_v48  ;;  %v2577_v48 = vpack.c.bf16 %v1195_v44, %v1191_v42  ;;  %v1662_v42 = vld [vmem:[#allocation7 + $0x328] sm:$0xff] }
 0x231   :  { %2183 = vmatmul.mubr.msk.f32.vlgmr.msra.gmra.mrb[4].mxu0 %vm415_vm0, %v3045_v39 }
 0x232   :  { %2330 = vmatprep.mubr.msk.f32.mxu0 %vm2903_vm5, %v2901_v0  ;;  %2525 = vmatpush3.bf16.msra.mxu0 %v2524_v21 }
 0x233   :  { %2526 = vmatprep.subr.bf16.mxu0 %v2902_v19 }
 0x236   :  { %2528 = vmatpush3.bf16.msra.mxu0 %v2527_v29 }
 0x237   :  { %2529 = vmatprep.subr.bf16.mxu0 %v2902_v19 }
 0x23a   :  { %2531 = vmatpush3.bf16.msra.mxu0 %v2530_v41  ;;  %v1196_v41 = vld [vmem:[#allocation7 + $0x2f8] sm:$0xff] }
 0x23b   :  { %2532 = vmatprep.subr.bf16.mxu0 %v2902_v19  ;;  %v2575_v43 = vpack.c.bf16 %v1196_v41, %v1192_v40  ;;  %v1658_v41 = vld [vmem:[#allocation7 + $0x308] sm:$0xff] }
 0x23c   :  { %v2619_v44 = vpack.c.bf16 %v1662_v42, %v1658_v41 }
 0x23e   :  { %2534 = vmatpush3.bf16.msra.mxu0 %v2533_v52  ;;  %v1370_v52 = vld [vmem:[#allocation10 + $0x138] sm:$0xff] }
 0x23f   :  { %2535 = vmatprep.subr.bf16.mxu0 %v2902_v19 }
 0x24b   :  { %v1047_v57 = vpop.f32.mrb[10].mxu1 }
 0x24c   :  { %v1049_v60 = vpop.f32.mrb[11].mxu1  ;;  %v1048_v61 = vadd.f32 %v1047_v57, %v901_v56  ;;  %v1085_v56 = vld [vmem:[#allocation11 + $0xc0] sm:$0xff]  ;;  %v1086_v57 = vld [vmem:[#allocation11 + $0xc8] sm:$0xff] }
 0x24d   :  { %v1050_v62 = vadd.f32 %v1049_v60, %v905_v58  ;;  %v2565_v58 = vpack.c.bf16 %v1171_v51, %v1167_v50  ;;  %v1175_v60 = vld [vmem:[#allocation7 + $0x250] sm:$0xff]  ;;  %v2542_v50 = vpack.c.bf16 %v1090_v47, %v1089_v46  ;;  %v1366_v51 = vld [vmem:[#allocation10 + $0x118] sm:$0xff]  ;;  %v1661_v46 = vld [vmem:[#allocation7 + $0x320] sm:$0xff] }
 0x24e   :  { %v3128_v63 = vmul.f32 %v1048_v61, %v866_v55  ;;  %v1180_v55 = vld [vmem:[#allocation7 + $0x278] sm:$0xff]  ;;  %v1179_v61 = vld [vmem:[#allocation7 + $0x270] sm:$0xff]  ;;  %v1666_v47 = vld [vmem:[#allocation7 + $0x348] sm:$0xff] }
 0x24f   :  { %v3130_v1 = vmul.f32 %v1050_v62, %v868_v59  ;;  %v2567_v59 = vpack.c.bf16 %v1180_v55, %v1176_v53  ;;  %v2536_v62 = vpack.c.bf16 %v1086_v57, %v1085_v56  ;;  %2566 = vmatpush1.bf16.msra.mxu1 %v2565_v58  ;;  %v2569_v2 = vpack.c.bf16 %v1179_v61, %v1175_v60  ;;  %v1365_v53 = vld [vmem:[#allocation10 + $0x110] sm:$0xff]  ;;  %v1092_v58 = vld [vmem:[#allocation11 + $0xf8] sm:$0xff] }
 0x250   :  { %v2587_v55 = vpack.c.bf16 %v1370_v52, %v1366_v51  ;;  %v1369_v56 = vld [vmem:[#allocation10 + $0x130] sm:$0xff]  ;;  %v1374_v60 = vld [vmem:[#allocation10 + $0x158] sm:$0xff] }
 0x251   :  { %2568 = vmatprep.subr.bf16.mxu1 %v2567_v59  ;;  %2537 = vmatpush3.bf16.msra.mxu0 %v2536_v62  ;;  %v1091_v57 = vld [vmem:[#allocation11 + $0xf0] sm:$0xff]  ;;  %v2589_v59 = vpack.c.bf16 %v1369_v56, %v1365_v53  ;;  %v1378_v61 = vld [vmem:[#allocation10 + $0x178] sm:$0xff]  ;;  %v1364_v62 = vld [vmem:[#allocation10 + $0x108] sm:$0xff] }
 0x252   :  { %2538 = vmatprep.subr.bf16.mxu0 %v2902_v19  ;;  %v1665_v52 = vld [vmem:[#allocation7 + $0x340] sm:$0xff]  ;;  %v1570_v56 = vld [vmem:[#allocation11 + $0x108] sm:$0xff] }
 0x253   :  { %2570 = vmatpush1.bf16.msra.mxu1 %v2569_v2  ;;  %v2545_v2 = vpack.c.bf16 %v1092_v58, %v1091_v57  ;;  %v1669_v53 = vld [vmem:[#allocation7 + $0x360] sm:$0xff]  ;;  %v1674_v57 = vld [vmem:[#allocation7 + $0x388] sm:$0xff] }
 0x254   :  { %v1678_v58 = vld [vmem:[#allocation7 + $0x3a8] sm:$0xff] }
 0x255   :  { %2540 = vmatpush3.bf16.msra.mxu0 %v2539_v38 }
 0x256   :  { %2541 = vmatprep.subr.bf16.mxu0 %v2902_v19 }
 0x259   :  { %2543 = vmatpush3.bf16.msra.mxu0 %v2542_v50 }
 0x25a   :  { %2544 = vmatprep.subr.bf16.mxu0 %v2902_v19 }
 0x25d   :  { %2546 = vmatpush3.bf16.msra.mxu0 %v2545_v2  ;;  %v1673_v2 = vld [vmem:[#allocation7 + $0x380] sm:$0xff] }
 0x2fc   :  { %v3140_v3 = vpop.f32.mrb[2].mxu0 }
 0x2fd   :  { %v2297_v4 = vpop.f32.mrb[3].mxu0 }
 0x2fe   :  { %v2591_v4 = vpack.c.bf16 %v1378_v61, %v1374_v60  ;;  %v1571_v61 = vld [vmem:[#allocation11 + $0x110] sm:$0xff] }
 0x304   :  { %v976_v11 = vpop.f32.mrb[4].mxu0 }
 0x305   :  { %v977_v13 = vadd.f32 %v976_v11, %v893_v8  ;;  %v978_v14 = vpop.f32.mrb[5].mxu0  ;;  %v1373_v8 = vld [vmem:[#allocation10 + $0x150] sm:$0xff] }
 0x306   :  { %v979_v16 = vadd.f32 %v978_v14, %v897_v10  ;;  %v2579_v10 = vpack.c.bf16 %v1368_v6, %v1364_v62  ;;  %v2593_v11 = vpack.c.bf16 %v1377_v9, %v1373_v8  ;;  %v2627_v62 = vpack.c.bf16 %v1678_v58, %v1674_v57  ;;  %v1572_v6 = vld [vmem:[#allocation11 + $0x118] sm:$0xff] }
 0x307   :  { %v1052_v17 = vmul.f32 %v977_v13, %v795_v12  ;;  %v3166_v12 = vpop.f32.mrb[12].mxu1  ;;  %v2599_v8 = vpack.c.bf16 %v1572_v6, %v1571_v61  ;;  %v1682_v9 = vld [vmem:[#allocation7 + $0x3c8] sm:$0xff] }
 0x308   :  { %v1053_v18 = vmul.f32 %v979_v16, %v797_v15  ;;  %2580 = vmatprep.subr.bf16.mxu0 %v2579_v10  ;;  %v3168_v13 = vpop.f32.mrb[13].mxu1  ;;  %v1367_v16 = vld [vmem:[#allocation10 + $0x120] sm:$0xff]  ;;  %v1686_v10 = vld [vmem:[#allocation7 + $0x3e8] sm:$0xff] }
 0x30a   :  { %v1056_v20 = vadd.f32 %v1053_v18, %v1052_v17  ;;  %v1372_v17 = vld [vmem:[#allocation10 + $0x148] sm:$0xff] }
 0x30b   :  { %v1376_v18 = vld [vmem:[#allocation10 + $0x168] sm:$0xff] }
 0x30c   :  { %v1057_v21 = vadd.f32 %v1056_v20, %v3128_v63  ;;  %v1184_v63 = vld [vmem:[#allocation7 + $0x298] sm:$0xff] }
 0x30e   :  { %v1058_v22 = vadd.f32 %v1057_v21, %v3130_v1  ;;  %v2571_v1 = vpack.c.bf16 %v1188_v30, %v1184_v63 }
 0x310   :  { %v1059_v23 = vand.u32 2147483647, %v1058_v22  ;;  %vm1067_vm8 = vcmp.lt.f32.partialorder %v1058_v22, 0.0  ;;  %2572 = vmatprep.subr.bf16.mxu1 %v2571_v1 }
 0x311   :  { %2574 = vmatpush1.bf16.msra.mxu1 %v2573_v35 }
 0x312   :  { %2711 = vrsqrt.f32 %v1059_v23  ;;  %vm1062_vm6 = vcmp.eq.f32.partialorder %v1059_v23, inf  ;;  %v1065_v54 = vand.u32 2147483648, %v1059_v23  ;;  %vm1064_vm7 = vcmp.eq.f32.partialorder %v1059_v23, 0.0  ;;  %2576 = vmatprep.subr.bf16.mxu1 %v2575_v43  ;;  %v1657_v43 = vld [vmem:[#allocation7 + $0x300] sm:$0xff] }
 0x313   :  { %v2621_v50 = vpack.c.bf16 %v1661_v46, %v1657_v43 }
 0x315   :  { %2578 = vmatpush1.bf16.msra.mxu1 %v2577_v48  ;;  %v1670_v48 = vld [vmem:[#allocation7 + $0x368] sm:$0xff] }
 0x316   :  { %2588 = vmatprep.subr.bf16.mxu1 %v2587_v55  ;;  %v2623_v51 = vpack.c.bf16 %v1670_v48, %v1666_v47  ;;  %v1569_v55 = vld [vmem:[#allocation11 + $0x100] sm:$0xff] }
 0x317   :  { %v2596_v60 = vpack.c.bf16 %v1570_v56, %v1569_v55 }
 0x318   :  { %2186 = vmatmul.mubr.msk.f32.vlgmr.msra.gmra.mrb[14].mxu1 %vm231_vm1, %v3049_v45  ;;  %v1363_v45 = vld [vmem:[#allocation10 + $0x100] sm:$0xff] }
 0x319   :  { %2590 = vmatpush1.bf16.msra.mxu1 %v2589_v59  ;;  %1537 = vmatprep.mubr.f32.mxu1 %v2901_v0  ;;  %v2581_v21 = vpack.c.bf16 %v1367_v16, %v1363_v45  ;;  %v2625_v59 = vpack.c.bf16 %v1669_v53, %v1665_v52  ;;  %v2631_v45 = vpack.c.bf16 %v1686_v10, %v1682_v9  ;;  %v1681_v16 = vld [vmem:[#allocation7 + $0x3c0] sm:$0xff]  ;;  %v1680_v9 = vld [vmem:[#allocation7 + $0x3b8] sm:$0xff]  ;;  %v1675_v10 = vld [vmem:[#allocation7 + $0x390] sm:$0xff] }
 0x31a   :  { %2592 = vmatprep.subr.bf16.mxu1 %v2591_v4  ;;  %v1677_v4 = vld [vmem:[#allocation7 + $0x3a0] sm:$0xff] }
 0x31c   :  { %v2712_v49 = vpop.eup %2711 }
 0x31d   :  { %v1061_v24 = vmul.f32 %v2712_v49, %v1059_v23  ;;  %2594 = vmatpush1.bf16.msra.mxu1 %v2593_v11  ;;  %v1371_v49 = vld [vmem:[#allocation10 + $0x140] sm:$0xff] }
 0x31e   :  { %2620 = vmatprep.subr.bf16.mxu1 %v2619_v44  ;;  %v1573_v11 = vld [vmem:[#allocation11 + $0x120] sm:$0xff] }
 0x31f   :  { %v1063_v25 = vsel %vm1062_vm6, %v1059_v23, %v1061_v24  ;;  %v2583_v23 = vpack.c.bf16 %v1376_v18, %v1372_v17  ;;  %v1375_v24 = vld [vmem:[#allocation10 + $0x160] sm:$0xff]  ;;  %v1685_v17 = vld [vmem:[#allocation7 + $0x3e0] sm:$0xff] }
 0x320   :  { %v1066_v32 = vsel %vm1064_vm7, %v1065_v54, %v1063_v25  ;;  %2189 = vmatmul.mubr.msk.f32.vlgmr.msra.gmra.mrb[16].mxu1 %vm415_vm0, %v3045_v39  ;;  %v2585_v54 = vpack.c.bf16 %v1375_v24, %v1371_v49  ;;  %v3177_v25 = vld [vmem:[#allocation8 + $0x8] sm:$0xf]  ;;  %v2633_v49 = vpack.c.bf16 %v1685_v17, %v1681_v16  ;;  %v1684_v17 = vld [vmem:[#allocation7 + $0x3d8] sm:$0xff] }
 0x321   :  { %v1068_v27 = vsub.f32 0.0, %v1066_v32  ;;  %1776 = vmatprep.mubr.f32.mxu1 %v2901_v0  ;;  %2622 = vmatpush1.bf16.msra.mxu1 %v2621_v50  ;;  %v1203_v46 = vrot.slane %v3177_v25, %v3069_v5  ;;  %v1207_v48 = vrot.slane %v3177_v25, %v3074_v7 }
 0x322   :  { %2624 = vmatprep.subr.bf16.mxu1 %v2623_v51 }
 0x323   :  { %v3154_v33 = vsel %vm1067_vm8, %v1068_v27, %v1066_v32  ;;  %v1211_v32 = vrot.slane %v3177_v25, %v3080_v26  ;;  %v1287_v52 = vadd.f32 %v3166_v12, %v1203_v46  ;;  %v1865_v46 = vld [vmem:[#allocation10 + $0x1d0] sm:$0xff] }
 0x324   :  { %v1070_v29 = vmul.f32 %v3154_v33, %v3154_v33 }
 0x325   :  { %2626 = vmatpush1.bf16.msra.mxu1 %v2625_v59 }
 0x326   :  { %1071 = vadd.xlane.f32.xlu0 %v1070_v29  ;;  %v3186_v29 = vld [vmem:[%s3282_s5 + $0x8] sm:$0xf]  ;;  %2628 = vmatprep.subr.bf16.mxu1 %v2627_v62 }
 0x327   :  { %v1397_v30 = vrot.slane %v3186_v29, %v3082_v28  ;;  %v1385_v47 = vrot.slane %v3186_v29, %v3069_v5  ;;  %v1389_v50 = vrot.slane %v3186_v29, %v3074_v7 }
 0x3b3   :  { %v1072_v14 = vpop.xlane.xlu0 %1071 }
 0x3b4   :  { %v1073_v15 = vmax.f32 %v1072_v14, 1e-24  ;;  %v1574_v14 = vld [vmem:[#allocation11 + $0x128] sm:$0xff] }
 0x3b5   :  { %v2602_v18 = vpack.c.bf16 %v1574_v14, %v1573_v11  ;;  %v1679_v11 = vld [vmem:[#allocation7 + $0x3b0] sm:$0xff] }
 0x3b6   :  { %2713 = vrsqrt.f32 %v1073_v15  ;;  %v2629_v15 = vpack.c.bf16 %v1677_v4, %v1673_v2  ;;  %v2645_v14 = vpack.c.bf16 %v1679_v11, %v1675_v10 }
 0x3b8   :  { %2630 = vmatpush1.bf16.msra.mxu1 %v2629_v15  ;;  %v1579_v15 = vld [vmem:[#allocation11 + $0x150] sm:$0xff] }
 0x3b9   :  { %2632 = vmatprep.subr.bf16.mxu1 %v2631_v45  ;;  %v1580_v45 = vld [vmem:[#allocation11 + $0x158] sm:$0xff] }
 0x3ba   :  { %v2611_v16 = vpack.c.bf16 %v1580_v45, %v1579_v15 }
 0x3bc   :  { %2634 = vmatpush1.bf16.msra.mxu1 %v2633_v49  ;;  %v1582_v49 = vld [vmem:[#allocation11 + $0x168] sm:$0xff] }
 0x3c0   :  { %v2714_v20 = vpop.eup %2713 }
 0x3c1   :  { %v1075_v22 = vmul.f32 %v2714_v20, %v3154_v33  ;;  %v1215_v33 = vrot.slane %v3177_v25, %v3082_v28  ;;  %v1660_v20 = vld [vmem:[#allocation7 + $0x318] sm:$0xff] }
 0x3c3   :  { %2331 = vmatmul.mubr.f32.vlgmr.msra.gmra.mrb[6].mxu0 %v1075_v22  ;;  %v1575_v22 = vld [vmem:[#allocation11 + $0x130] sm:$0xff] }
 0x3c4   :  { %2582 = vmatpush1.bf16.msra.mxu0 %v2581_v21  ;;  %1466 = vmatprep.mubr.f32.mxu0 %v2901_v0  ;;  %v1664_v21 = vld [vmem:[#allocation7 + $0x338] sm:$0xff] }
 0x3c5   :  { %2584 = vmatprep.subr.bf16.mxu0 %v2583_v23  ;;  %v1576_v23 = vld [vmem:[#allocation11 + $0x138] sm:$0xff]  ;;  %v2635_v24 = vpack.c.bf16 %v1664_v21, %v1660_v20  ;;  %v1683_v20 = vld [vmem:[#allocation7 + $0x3d0] sm:$0xff] }
 0x3c7   :  { %2636 = vmatprep.subr.bf16.mxu1 %v2635_v24 }
 0x3c8   :  { %2586 = vmatpush1.bf16.msra.mxu0 %v2585_v54  ;;  %v1659_v54 = vld [vmem:[#allocation7 + $0x310] sm:$0xff] }
 0x3c9   :  { %2595 = vmatprep.subr.bf16.mxu0 %v2902_v19 }
 0x3cb   :  { %2188 = vmatmul.mubr.msk.f32.vlgmr.msra.gmra.mrb[8].mxu0 %vm415_vm0, %v3045_v39  ;;  %v1393_v39 = vrot.slane %v3186_v29, %v3080_v26 }
 0x3cc   :  { %2365 = vmatprep.mubr.msk.f32.mxu0 %vm2903_vm5, %v2901_v0  ;;  %2597 = vmatpush3.bf16.msra.mxu0 %v2596_v60 }
 0x3cd   :  { %2598 = vmatprep.subr.bf16.mxu0 %v2902_v19 }
 0x3d0   :  { %2600 = vmatpush3.bf16.msra.mxu0 %v2599_v8 }
 0x3d1   :  { %2601 = vmatprep.subr.bf16.mxu0 %v2902_v19 }
 0x3d4   :  { %2603 = vmatpush3.bf16.msra.mxu0 %v2602_v18  ;;  %v1688_v18 = vld [vmem:[#allocation7 + $0x3f8] sm:$0xff] }
 0x3d5   :  { %2604 = vmatprep.subr.bf16.mxu0 %v2902_v19  ;;  %v2647_v21 = vpack.c.bf16 %v1688_v18, %v1684_v17  ;;  %v2061_v18 = vld [vmem:[#allocation11 + $0x180] sm:$0xff] }
 0x3eb   :  { %v1357_v27 = vpop.f32.mrb[14].mxu1 }
 0x3ec   :  { %v1359_v63 = vpop.f32.mrb[15].mxu1  ;;  %v1358_v1 = vadd.f32 %v1357_v27, %v1211_v32  ;;  %v1663_v32 = vld [vmem:[#allocation7 + $0x330] sm:$0xff]  ;;  %v2605_v27 = vpack.c.bf16 %v1576_v23, %v1575_v22 }
 0x3ed   :  { %v1360_v31 = vadd.f32 %v1359_v63, %v1215_v33  ;;  %v1668_v33 = vld [vmem:[#allocation7 + $0x358] sm:$0xff]  ;;  %v1687_v22 = vld [vmem:[#allocation7 + $0x3f0] sm:$0xff] }
 0x3ee   :  { %v1672_v63 = vld [vmem:[#allocation7 + $0x378] sm:$0xff]  ;;  %2606 = vmatpush3.bf16.msra.mxu0 %v2605_v27  ;;  %v1581_v23 = vld [vmem:[#allocation11 + $0x160] sm:$0xff]  ;;  %v2649_v24 = vpack.c.bf16 %v1687_v22, %v1683_v20  ;;  %v1862_v27 = vld [vmem:[#allocation10 + $0x1b8] sm:$0xff] }
 0x3ef   :  { %2607 = vmatprep.subr.bf16.mxu0 %v2902_v19  ;;  %v2062_v20 = vld [vmem:[#allocation11 + $0x188] sm:$0xff] }
 0x3f0   :  { %v2668_v22 = vpack.c.bf16 %v2062_v20, %v2061_v18 }
 0x3f3   :  { %v1539_v34 = vpop.f32.mrb[16].mxu1 }
 0x3f4   :  { %v1540_v35 = vadd.f32 %v1539_v34, %v1393_v39  ;;  %v1541_v36 = vpop.f32.mrb[17].mxu1  ;;  %v1577_v39 = vld [vmem:[#allocation11 + $0x140] sm:$0xff] }
 0x3f5   :  { %v1542_v37 = vadd.f32 %v1541_v36, %v1397_v30  ;;  %v1578_v30 = vld [vmem:[#allocation11 + $0x148] sm:$0xff]  ;;  %v1667_v34 = vld [vmem:[#allocation7 + $0x350] sm:$0xff] }
 0x3f6   :  { %v3192_v38 = vmul.f32 %v1540_v35, %v1358_v1  ;;  %v2637_v1 = vpack.c.bf16 %v1663_v32, %v1659_v54  ;;  %v1671_v35 = vld [vmem:[#allocation7 + $0x370] sm:$0xff]  ;;  %v2608_v36 = vpack.c.bf16 %v1578_v30, %v1577_v39  ;;  %v2614_v54 = vpack.c.bf16 %v1582_v49, %v1581_v23  ;;  %v1858_v32 = vld [vmem:[#allocation10 + $0x198] sm:$0xff]  ;;  %v1861_v39 = vld [vmem:[#allocation10 + $0x1b0] sm:$0xff] }
 0x3f7   :  { %v3194_v40 = vmul.f32 %v1542_v37, %v1360_v31  ;;  %v2639_v31 = vpack.c.bf16 %v1672_v63, %v1668_v33  ;;  %v3199_v37 = vld [vmem:[#allocation2] sm:$0xff]  ;;  %v2641_v41 = vpack.c.bf16 %v1671_v35, %v1667_v34  ;;  %v1857_v33 = vld [vmem:[#allocation10 + $0x190] sm:$0xff]  ;;  %v2659_v63 = vpack.c.bf16 %v1862_v27, %v1858_v32  ;;  %v1866_v34 = vld [vmem:[#allocation10 + $0x1d8] sm:$0xff] }
 0x3f8   :  { %2190 = vmatmul.mubr.msk.f32.vlgmr.msra.gmra.mrb[18].mxu1 %vm231_vm1, %v3199_v37  ;;  %2609 = vmatpush3.bf16.msra.mxu0 %v2608_v36  ;;  %v1583_v30 = vld [vmem:[#allocation11 + $0x170] sm:$0xff]  ;;  %v1870_v35 = vld [vmem:[#allocation10 + $0x1f8] sm:$0xff]  ;;  %v1856_v36 = vld [vmem:[#allocation10 + $0x188] sm:$0xff] }
 0x3f9   :  { %2638 = vmatpush1.bf16.msra.mxu1 %v2637_v1  ;;  %1847 = vmatprep.mubr.f32.mxu1 %v2901_v0  ;;  %v1584_v1 = vld [vmem:[#allocation11 + $0x178] sm:$0xff] }
 0x3fa   :  { %2640 = vmatprep.subr.bf16.mxu1 %v2639_v31  ;;  %2610 = vmatprep.subr.bf16.mxu0 %v2902_v19  ;;  %v2661_v31 = vpack.c.bf16 %v1861_v39, %v1857_v33  ;;  %v2064_v23 = vld [vmem:[#allocation11 + $0x198] sm:$0xff] }
 0x3fb   :  { %v2068_v32 = vld [vmem:[#allocation11 + $0x1b8] sm:$0xff] }
 0x3fc   :  { %2612 = vmatpush3.bf16.msra.mxu0 %v2611_v16 }
 0x3fd   :  { %2642 = vmatpush1.bf16.msra.mxu1 %v2641_v41  ;;  %2613 = vmatprep.subr.bf16.mxu0 %v2902_v19  ;;  %v2617_v41 = vpack.c.bf16 %v1584_v1, %v1583_v30 }
 0x400   :  { %2615 = vmatpush3.bf16.msra.mxu0 %v2614_v54  ;;  %v2067_v54 = vld [vmem:[#allocation11 + $0x1b0] sm:$0xff] }
 0x401   :  { %2616 = vmatprep.subr.bf16.mxu0 %v2902_v19  ;;  %v2677_v27 = vpack.c.bf16 %v2068_v32, %v2067_v54 }
 0x404   :  { %2618 = vmatpush3.bf16.msra.mxu0 %v2617_v41 }
 0x496   :  { %v1159_v42 = vpop.f32.mrb[6].mxu0 }
 0x497   :  { %v3207_v43 = vadd.f32 %v1159_v42, %v3140_v3  ;;  %v2332_v44 = vpop.f32.mrb[7].mxu0  ;;  %v1289_v3 = vadd.f32 %v3168_v13, %v1207_v48  ;;  %v2663_v42 = vpack.c.bf16 %v1870_v35, %v1866_v34 }
 0x498   :  { %v1860_v44 = vld [vmem:[#allocation10 + $0x1a8] sm:$0xff] }
 0x499   :  { %v2651_v48 = vpack.c.bf16 %v1860_v44, %v1856_v36 }
 0x49b   :  { %2652 = vmatprep.subr.bf16.mxu0 %v2651_v48 }
 0x49e   :  { %v1468_v51 = vpop.f32.mrb[8].mxu0 }
 0x49f   :  { %v1469_v53 = vadd.f32 %v1468_v51, %v1385_v47  ;;  %v1470_v55 = vpop.f32.mrb[9].mxu0  ;;  %v1869_v47 = vld [vmem:[#allocation10 + $0x1f0] sm:$0xff]  ;;  %v2724_v51 = vld [vmem:[#allocation5] sm:$0xff] }
 0x4a0   :  { %v1471_v56 = vadd.f32 %v1470_v55, %v1389_v50  ;;  %v2665_v50 = vpack.c.bf16 %v1869_v47, %v1865_v46 }
 0x4a1   :  { %v1544_v57 = vmul.f32 %v1469_v53, %v1287_v52 }
 0x4a2   :  { %v1545_v58 = vmul.f32 %v1471_v56, %v1289_v3  ;;  %v1855_v56 = vld [vmem:[#allocation10 + $0x180] sm:$0xff] }
 0x4a4   :  { %v1548_v59 = vadd.f32 %v1545_v58, %v1544_v57  ;;  %v1864_v57 = vld [vmem:[#allocation10 + $0x1c8] sm:$0xff] }
 0x4a5   :  { %v1868_v58 = vld [vmem:[#allocation10 + $0x1e8] sm:$0xff] }
 0x4a6   :  { %v1549_v60 = vadd.f32 %v1548_v59, %v3192_v38  ;;  %v1676_v38 = vld [vmem:[#allocation7 + $0x398] sm:$0xff] }
 0x4a8   :  { %v1550_v61 = vadd.f32 %v1549_v60, %v3194_v40  ;;  %v2643_v40 = vpack.c.bf16 %v1680_v9, %v1676_v38 }
 0x4aa   :  { %v1551_v62 = vand.u32 2147483647, %v1550_v61  ;;  %vm1559_vm11 = vcmp.lt.f32.partialorder %v1550_v61, 0.0  ;;  %2644 = vmatprep.subr.bf16.mxu1 %v2643_v40 }
 0x4ab   :  { %2646 = vmatpush1.bf16.msra.mxu1 %v2645_v14 }
 0x4ac   :  { %2715 = vrsqrt.f32 %v1551_v62  ;;  %vm1554_vm9 = vcmp.eq.f32.partialorder %v1551_v62, inf  ;;  %v1557_v29 = vand.u32 2147483648, %v1551_v62  ;;  %vm1556_vm10 = vcmp.eq.f32.partialorder %v1551_v62, 0.0  ;;  %2648 = vmatprep.subr.bf16.mxu1 %v2647_v21  ;;  %v2063_v21 = vld [vmem:[#allocation11 + $0x190] sm:$0xff] }
 0x4ad   :  { %v2671_v49 = vpack.c.bf16 %v2064_v23, %v2063_v21 }
 0x4af   :  { %2650 = vmatpush1.bf16.msra.mxu1 %v2649_v24  ;;  %v2066_v24 = vld [vmem:[#allocation11 + $0x1a8] sm:$0xff] }
 0x4b0   :  { %2660 = vmatprep.subr.bf16.mxu1 %v2659_v63 }
 0x4b2   :  { %2191 = vmatmul.mubr.msk.f32.vlgmr.msra.gmra.mrb[20].mxu1 %vm231_vm1, %v3199_v37  ;;  %v1859_v37 = vld [vmem:[#allocation10 + $0x1a0] sm:$0xff] }
 0x4b3   :  { %2662 = vmatpush1.bf16.msra.mxu1 %v2661_v31  ;;  %2029 = vmatprep.mubr.f32.mxu1 %v2901_v0  ;;  %v2653_v60 = vpack.c.bf16 %v1859_v37, %v1855_v56 }
 0x4b4   :  { %2664 = vmatprep.subr.bf16.mxu1 %v2663_v42 }
 0x4b6   :  { %v2716_v25 = vpop.eup %2715 }
 0x4b7   :  { %v1553_v2 = vmul.f32 %v2716_v25, %v1551_v62  ;;  %2666 = vmatpush1.bf16.msra.mxu1 %v2665_v50  ;;  %v1863_v25 = vld [vmem:[#allocation10 + $0x1c0] sm:$0xff] }
 0x4b9   :  { %v1555_v4 = vsel %vm1554_vm9, %v1551_v62, %v1553_v2  ;;  %v2655_v62 = vpack.c.bf16 %v1868_v58, %v1864_v57  ;;  %v1867_v2 = vld [vmem:[#allocation10 + $0x1e0] sm:$0xff] }
 0x4ba   :  { %v1558_v12 = vsel %vm1556_vm10, %v1557_v29, %v1555_v4  ;;  %2194 = vmatmul.mubr.msk.f32.vlgmr.msra.gmra.mrb[22].mxu1 %vm415_vm0, %v2724_v51  ;;  %v2657_v29 = vpack.c.bf16 %v1867_v2, %v1863_v25  ;;  %v1690_v4 = vld [vmem:[#allocation8 + $0xc] sm:$0xf]  ;;  %v2073_v2 = vld [vmem:[#allocation11 + $0x1e0] sm:$0xff] }
 0x4bb   :  { %v1560_v6 = vsub.f32 0.0, %v1558_v12  ;;  %v1695_v30 = vrot.slane %v1690_v4, %v3069_v5  ;;  %v1699_v31 = vrot.slane %v1690_v4, %v3074_v7 }
 0x4bd   :  { %v3221_v13 = vsel %vm1559_vm11, %v1560_v6, %v1558_v12  ;;  %v1703_v12 = vrot.slane %v1690_v4, %v3080_v26 }
 0x4be   :  { %v1562_v8 = vmul.f32 %v3221_v13, %v3221_v13 }
 0x4c0   :  { %1563 = vadd.xlane.f32.xlu1 %v1562_v8  ;;  %v2192_v8 = vld [vmem:[%s3282_s5 + $0xc] sm:$0xf] }
 0x4c1   :  { %v1885_v9 = vrot.slane %v2192_v8, %v3080_v26  ;;  %v1889_v40 = vrot.slane %v2192_v8, %v3082_v28  ;;  %v2065_v26 = vld [vmem:[#allocation11 + $0x1a0] sm:$0xff]  ;;  %v1877_v1 = vrot.slane %v2192_v8, %v3069_v5  ;;  %v1881_v34 = vrot.slane %v2192_v8, %v3074_v7 }
 0x4cb   :  { %v3231_v52 = vpop.f32.mrb[18].mxu1 }
 0x4cc   :  { %v3233_v53 = vpop.f32.mrb[19].mxu1  ;;  %v1779_v36 = vadd.f32 %v3231_v52, %v1695_v30 }
 0x4cd   :  { %v1781_v44 = vadd.f32 %v3233_v53, %v1699_v31  ;;  %v2069_v53 = vld [vmem:[#allocation11 + $0x1c0] sm:$0xff] }
 0x54d   :  { %v1564_v55 = vpop.xlane.xlu1 %1563 }
 0x54e   :  { %v1565_v3 = vmax.f32 %v1564_v55, 1e-24 }
 0x550   :  { %2717 = vrsqrt.f32 %v1565_v3 }
 0x55a   :  { %v2718_v59 = vpop.eup %2717 }
 0x55b   :  { %v1567_v61 = vmul.f32 %v2718_v59, %v3221_v13  ;;  %v1707_v13 = vrot.slane %v1690_v4, %v3082_v28  ;;  %v2674_v28 = vpack.c.bf16 %v2066_v24, %v2065_v26  ;;  %v2070_v59 = vld [vmem:[#allocation11 + $0x1c8] sm:$0xff] }
 0x55d   :  { %2366 = vmatmul.mubr.f32.vlgmr.msra.gmra.mrb[10].mxu0 %v1567_v61  ;;  %v2071_v61 = vld [vmem:[#allocation11 + $0x1d0] sm:$0xff] }
 0x55e   :  { %2654 = vmatpush1.bf16.msra.mxu0 %v2653_v60  ;;  %1958 = vmatprep.mubr.f32.mxu0 %v2901_v0  ;;  %v2680_v60 = vpack.c.bf16 %v2070_v59, %v2069_v53 }
 0x55f   :  { %2656 = vmatprep.subr.bf16.mxu0 %v2655_v62  ;;  %v2072_v62 = vld [vmem:[#allocation11 + $0x1d8] sm:$0xff] }
 0x560   :  { %v2683_v25 = vpack.c.bf16 %v2072_v62, %v2071_v61 }
 0x562   :  { %2658 = vmatpush1.bf16.msra.mxu0 %v2657_v29  ;;  %v2074_v29 = vld [vmem:[#allocation11 + $0x1e8] sm:$0xff] }
 0x563   :  { %2667 = vmatprep.subr.bf16.mxu0 %v2902_v19  ;;  %v2686_v4 = vpack.c.bf16 %v2074_v29, %v2073_v2 }
 0x565   :  { %2193 = vmatmul.mubr.msk.f32.vlgmr.msra.gmra.mrb[12].mxu0 %vm415_vm0, %v2724_v51 }
 0x566   :  { %2400 = vmatprep.mubr.msk.f32.mxu0 %vm2903_vm5, %v2901_v0  ;;  %2669 = vmatpush3.bf16.msra.mxu0 %v2668_v22 }
 0x567   :  { %2670 = vmatprep.subr.bf16.mxu0 %v2902_v19 }
 0x56a   :  { %2672 = vmatpush3.bf16.msra.mxu0 %v2671_v49 }
 0x56b   :  { %2673 = vmatprep.subr.bf16.mxu0 %v2902_v19 }
 0x56e   :  { %2675 = vmatpush3.bf16.msra.mxu0 %v2674_v28 }
 0x56f   :  { %2676 = vmatprep.subr.bf16.mxu0 %v2902_v19 }
 0x572   :  { %2678 = vmatpush3.bf16.msra.mxu0 %v2677_v27 }
 0x573   :  { %2679 = vmatprep.subr.bf16.mxu0 %v2902_v19 }
 0x576   :  { %2681 = vmatpush3.bf16.msra.mxu0 %v2680_v60 }
 0x577   :  { %2682 = vmatprep.subr.bf16.mxu0 %v2902_v19 }
 0x57a   :  { %2684 = vmatpush3.bf16.msra.mxu0 %v2683_v25 }
 0x57b   :  { %2685 = vmatprep.subr.bf16.mxu0 %v2902_v19 }
 0x57e   :  { %2687 = vmatpush3.bf16.msra.mxu0 %v2686_v4 }
 0x57f   :  { %2688 = vmatprep.subr.bf16.mxu0 %v2902_v19 }
 0x585   :  { %v1849_v6 = vpop.f32.mrb[20].mxu1 }
 0x586   :  { %v1851_v38 = vpop.f32.mrb[21].mxu1  ;;  %v1850_v10 = vadd.f32 %v1849_v6, %v1703_v12  ;;  %v2075_v12 = vld [vmem:[#allocation11 + $0x1f0] sm:$0xff]  ;;  %v2076_v6 = vld [vmem:[#allocation11 + $0x1f8] sm:$0xff] }
 0x587   :  { %v1852_v11 = vadd.f32 %v1851_v38, %v1707_v13  ;;  %v2689_v13 = vpack.c.bf16 %v2076_v6, %v2075_v12 }
 0x589   :  { %2690 = vmatpush3.bf16.msra.mxu0 %v2689_v13 }
 0x58d   :  { %v2031_v14 = vpop.f32.mrb[22].mxu1 }
 0x58e   :  { %v2032_v15 = vadd.f32 %v2031_v14, %v1885_v9  ;;  %v2033_v0 = vpop.f32.mrb[23].mxu1 }
 0x58f   :  { %v2034_v45 = vadd.f32 %v2033_v0, %v1889_v40 }
 0x590   :  { %v2038_v16 = vmul.f32 %v2032_v15, %v1850_v10  ;;  %v2175_v10 = vld [vmem:[%s3284_s7] ss:$0 sm:$0xff] }
 0x591   :  { %v2039_v17 = vmul.f32 %v2034_v45, %v1852_v11 }
 0x630   :  { %v1651_v33 = vpop.f32.mrb[10].mxu0 }
 0x631   :  { %v1655_v63 = vadd.f32 %v1651_v33, %v3207_v43  ;;  %v2367_v39 = vpop.f32.mrb[11].mxu0 }
 0x638   :  { %v1960_v35 = vpop.f32.mrb[12].mxu0 }
 0x639   :  { %v1961_v41 = vadd.f32 %v1960_v35, %v1877_v1  ;;  %v1962_v42 = vpop.f32.mrb[13].mxu0 }
 0x63a   :  { %v1963_v46 = vadd.f32 %v1962_v42, %v1881_v34 }
 0x63b   :  { %v2036_v47 = vmul.f32 %v1961_v41, %v1779_v36 }
 0x63c   :  { %v2037_v48 = vmul.f32 %v1963_v46, %v1781_v44 }
 0x63e   :  { %v2040_v43 = vadd.f32 %v2037_v48, %v2036_v47 }
 0x640   :  { %v2041_v50 = vadd.f32 %v2040_v43, %v2038_v16 }
 0x642   :  { %v2042_v51 = vadd.f32 %v2041_v50, %v2039_v17 }
 0x644   :  { %v2043_v55 = vand.u32 2147483647, %v2042_v51  ;;  %vm2051_vm14 = vcmp.lt.f32.partialorder %v2042_v51, 0.0 }
 0x646   :  { %2719 = vrsqrt.f32 %v2043_v55  ;;  %vm2046_vm12 = vcmp.eq.f32.partialorder %v2043_v55, inf  ;;  %v2049_v56 = vand.u32 2147483648, %v2043_v55  ;;  %vm2048_vm13 = vcmp.eq.f32.partialorder %v2043_v55, 0.0 }
 0x650   :  { %v2720_v5 = vpop.eup %2719 }
 0x651   :  { %v2045_v3 = vmul.f32 %v2720_v5, %v2043_v55 }
 0x653   :  { %v2047_v7 = vsel %vm2046_vm12, %v2043_v55, %v2045_v3 }
 0x654   :  { %v2050_v37 = vsel %vm2048_vm13, %v2049_v56, %v2047_v7 }
 0x655   :  { %v2052_v52 = vsub.f32 0.0, %v2050_v37 }
 0x657   :  { %v2053_v57 = vsel %vm2051_vm14, %v2052_v52, %v2050_v37 }
 0x658   :  { %v2054_v58 = vmul.f32 %v2053_v57, %v2053_v57 }
 0x65a   :  { %2055 = vadd.xlane.f32.xlu1 %v2054_v58 }
 0x6e7   :  { %v2056_v8 = vpop.xlane.xlu1 %2055 }
 0x6e8   :  { %v2057_v38 = vmax.f32 %v2056_v8, 1e-24 }
 0x6ea   :  { %2721 = vrsqrt.f32 %v2057_v38 }
 0x6f4   :  { %v2722_v9 = vpop.eup %2721 }
 0x6f5   :  { %v2059_v40 = vmul.f32 %v2722_v9, %v2053_v57 }
 0x6f7   :  { %2401 = vmatmul.mubr.f32.vlgmr.msra.gmra.mrb[14].mxu0 %v2059_v40 }
 0x7ca   :  { %v2143_v11 = vpop.f32.mrb[14].mxu0 }
 0x7cb   :  { %v2147_v14 = vadd.f32 %v2143_v11, %v1655_v63  ;;  %v2402_v15 = vpop.f32.mrb[15].mxu0 }
 0x7cd   :  { %v2149_v0 = vadd.f32 %v2175_v10, %v2147_v14 }
 0x7cf   :  { %2150 = vst [vmem:[#allocation13] sm:$0xff] %v2149_v0 }
 0x7d0   :  { %2868 = shalt.err (!%p2865_p10)
}
 0x7d1   :  { %s2869_s12 = scalar_lea.hbm %s3285_s8, 128 }
 0x7d2   :  { %p2870_p11 = scmp.ne.s32.totalorder %s3285_s8, %s2869_s12  ;;  %p2873_p12 = scmp.lt.u32.totalorder %s2869_s12, %s3285_s8 }
 0x7d4   :  { %p2875_p13 = pnand %p2873_p12, %p2870_p11 }
 0x7d6   :  { %2878 = shalt.err (!%p2875_p13)
}
 0x7d7   :  { %2160 = dma.vmem_to_hbm [thread:$0]  %s2158_s19, 128, %s3285_s8, [#allocation4]  }
 0x7d8   :  { %2887 = dma.done.wait [#allocation4], 128  }
 0x7d9   :  { %2888 = vsyncadd [#allocation4], 4294967168 }
 0x7da   :  { %2164 = vsyncpa [#allocation3], 1 }
 0x7db   :  { %2165 = vsyncpa [#allocation6], 1 }
 0x7dc   :  { %2166 = vsyncpa [#allocation9], 1 }
 0x7dd   :  { %2167 = vsyncpa [#allocation12], 1 }
 0x7de   :  { %2168 = vsyncpa [#allocation4], 1 }

</bundles_post_ra>
